<compile_context>
chip_gen: v7x
topology: tpu7x:2x2x1
jax: 0.10.0
libtpu: 0.0.40
codegen_flags: <defaults>
</compile_context>

<pallas_src>
import functools
import numpy as np

import jax
import jax.numpy as jnp
from jax.experimental import pallas as pl
from jax.experimental.pallas import tpu as pltpu

LN_EPS = 1e-5
MATMUL_DTYPE = jnp.bfloat16          # MXU operand dtype (f32 accumulation)
VMEM_LIMIT = 48 * 1024 * 1024        # <= v7x 64 MiB, > 16/32 MiB scoped defaults


# ----------------------------------------------------------------------------
# Buffered(1) feature probe: single-buffer constant operands when supported.
# ----------------------------------------------------------------------------
_SINGLE_BUFFER_CONSTS = None


def _probe_single_buffer():
    try:
        cspec = pl.BlockSpec((8, 128), lambda i: (0, 0),
                             pipeline_mode=pl.Buffered(1))

        def k(c_ref, x_ref, o_ref):
            o_ref[...] = x_ref[...] + c_ref[...]

        out = pl.pallas_call(
            k,
            out_shape=jax.ShapeDtypeStruct((16, 128), jnp.float32),
            grid=(2,),
            in_specs=[cspec, pl.BlockSpec((8, 128), lambda i: (i, 0))],
            out_specs=pl.BlockSpec((8, 128), lambda i: (i, 0)),
        )(jnp.ones((8, 128), jnp.float32), jnp.zeros((16, 128), jnp.float32))
        jax.block_until_ready(out)
        return True
    except Exception:
        return False


def _const_spec(shape, index_map):
    """BlockSpec for a block whose index never changes across the grid:
    single-buffer it (halves its VMEM footprint) when the API supports it."""
    global _SINGLE_BUFFER_CONSTS
    if _SINGLE_BUFFER_CONSTS is None:
        _SINGLE_BUFFER_CONSTS = _probe_single_buffer()
    if _SINGLE_BUFFER_CONSTS:
        return pl.BlockSpec(shape, index_map, pipeline_mode=pl.Buffered(1))
    return pl.BlockSpec(shape, index_map)


# ----------------------------------------------------------------------------
# tanh-approx GELU (matches jax.nn.gelu(approximate=True)); tanh lands on EUP.
# ----------------------------------------------------------------------------
def _gelu_tanh(x):
    return 0.5 * x * (1.0 + jnp.tanh(0.7978845608028654 * (x + 0.044715 * x * x * x)))


# ----------------------------------------------------------------------------
# Pallas kernel 1: fused  LN1 + window attention + fused output proj + residual
# ----------------------------------------------------------------------------
def _fused_window_attn_kernel(*refs, num_heads, head_dim, use_mask, use_valid,
                              mm_dtype, eps):
    it = iter(refs)
    xw_ref = next(it)                    # (Wb, N, C) f32  pre-LN shortcut windows
    vw_ref = next(it)                    # (Wb, N, C) bf16 value windows
    relb_ref = next(it)                  # (nh, N, N) f32  relative position bias
    mask_ref = next(it) if use_mask else None    # (Wb, N, N) f32 shift mask tile
    valid_ref = next(it) if use_valid else None  # (Wb*N, 1) f32 pad-valid mask
    g_ref = next(it)                     # (1, C)
    b_ref = next(it)                     # (1, C)
    wqk_ref = next(it)                   # (C, 2C) bf16, q half pre-scaled
    bqk_ref = next(it)                   # (1, 2C) f32, q half pre-scaled
    wproj_ref = next(it)                 # (C, C)  bf16
    bproj_ref = next(it)                 # (1, C)  f32
    out_ref = next(it)                   # (Wb, N, C) f32
    o_scr = next(it)                     # (Wb*N, C) bf16 scratch (per-head concat)

    Wb, N, C = xw_ref.shape
    M = Wb * N

    x2 = xw_ref[...].reshape(M, C)       # free leading-dim collapse (N % 8 == 0)

    # ---- LayerNorm1 (f32, VPU/XLU) -------------------------------------
    mean = jnp.mean(x2, axis=-1, keepdims=True)
    xc = x2 - mean
    var = jnp.mean(xc * xc, axis=-1, keepdims=True)
    ln = xc * jax.lax.rsqrt(var + eps) * g_ref[0] + b_ref[0]
    if use_valid:
        # zero padded tokens so they match "LN then zero-pad" reference semantics
        ln = ln * valid_ref[...]

    # ---- qk projection: ONE (M, C) @ (C, 2C) MXU matmul ----------------
    qk = jnp.dot(ln.astype(mm_dtype), wqk_ref[...],
                 preferred_element_type=jnp.float32) + bqk_ref[0]
    q3 = qk[:, :C].reshape(Wb, N, C)     # q channels are head-major, pre-scaled
    k3 = qk[:, C:].reshape(Wb, N, C)
    v3 = vw_ref[...]                     # (Wb, N, C) bf16

    # ---- per-head attention; heads written into a (M, C) scratch -------
    for h in range(num_heads):           # static unroll; nh is small
        lo = h * head_dim
        hi = lo + head_dim
        qh = q3[:, :, lo:hi].astype(mm_dtype)
        kh = k3[:, :, lo:hi].astype(mm_dtype)

        logits = jnp.einsum('wnd,wmd->wnm', qh, kh,
                            preferred_element_type=jnp.float32)      # (Wb,N,N)
        logits = logits + relb_ref[h]
        if use_mask:
            logits = logits + mask_ref[...]

        logits = logits - jnp.max(logits, axis=-1, keepdims=True)
        p = jnp.exp(logits)
        p = p * pl.reciprocal(jnp.sum(p, axis=-1, keepdims=True), approx=True)

        oh = jnp.einsum('wnm,wmd->wnd', p.astype(mm_dtype), v3[:, :, lo:hi],
                        preferred_element_type=jnp.float32)          # (Wb,N,hd)
        o_scr[:, lo:hi] = oh.reshape(M, head_dim).astype(mm_dtype)

    # ---- fused output projection: ONE (M, C) @ (C, C) MXU matmul -------
    proj = jnp.dot(o_scr[...], wproj_ref[...],
                   preferred_element_type=jnp.float32)
    out = x2 + proj + bproj_ref[0]       # fused attention residual (f32)
    out_ref[...] = out.reshape(Wb, N, C)


def _window_tile(nW, cap=8):
    """Largest divisor of nW that is <= cap and (when possible) leaves >= 2
    window tiles, so a single-image batch still has >= 2 parallel grid steps."""
    limit = min(cap, nW // 2) if nW >= 2 else nW
    best = 1
    for t in range(1, max(limit, 1) + 1):
        if nW % t == 0:
            best = t
    return best


def fused_window_attention_pallas(xw, vw, relb, mask, valid, ln_g, ln_b,
                                  wqk, bqk, wproj, bproj, num_heads, nW):
    """xw: (B*nW, N, C) pre-LN shortcut windows; returns shortcut+attn, same shape."""
    nWB, N, C = xw.shape
    assert nWB % nW == 0
    B = nWB // nW
    Wb = _window_tile(nW)
    WT = nW // Wb
    head_dim = C // num_heads
    use_mask = mask is not None
    use_valid = valid is not None
    mm_dtype = wqk.dtype

    kernel = functools.partial(
        _fused_window_attn_kernel, num_heads=num_heads, head_dim=head_dim,
        use_mask=use_mask, use_valid=use_valid, mm_dtype=mm_dtype, eps=LN_EPS)

    def win_idx(b, w):
        return (b * WT + w, 0, 0)

    in_specs = [
        pl.BlockSpec((Wb, N, C), win_idx),                        # x windows
        pl.BlockSpec((Wb, N, C), win_idx),                        # v windows
        _const_spec((num_heads, N, N), lambda b, w: (0, 0, 0)),   # rel-pos bias
    ]
    args = [xw, vw, relb]
    if use_mask:
        in_specs.append(pl.BlockSpec((Wb, N, N), lambda b, w: (w, 0, 0)))
        args.append(mask)
    if use_valid:
        in_specs.append(pl.BlockSpec((Wb * N, 1), lambda b, w: (w, 0)))
        args.append(valid)
    in_specs += [
        _const_spec((1, C), lambda b, w: (0, 0)),                 # ln1 gamma
        _const_spec((1, C), lambda b, w: (0, 0)),                 # ln1 beta
        _const_spec((C, 2 * C), lambda b, w: (0, 0)),             # wqk (scaled)
        _const_spec((1, 2 * C), lambda b, w: (0, 0)),             # bqk (scaled)
        _const_spec((C, C), lambda b, w: (0, 0)),                 # wproj
        _const_spec((1, C), lambda b, w: (0, 0)),                 # bproj
    ]
    args += [ln_g.reshape(1, C), ln_b.reshape(1, C),
             wqk, bqk.reshape(1, 2 * C), wproj, bproj.reshape(1, C)]

    return pl.pallas_call(
        kernel,
        out_shape=jax.ShapeDtypeStruct((nWB, N, C), jnp.float32),
        grid=(B, WT),
        in_specs=in_specs,
        out_specs=pl.BlockSpec((Wb, N, C), win_idx),
        scratch_shapes=[pltpu.VMEM((Wb * N, C), mm_dtype)],
        compiler_params=pltpu.CompilerParams(
            dimension_semantics=("parallel", "parallel"),
            vmem_limit_bytes=VMEM_LIMIT),
    )(*args)


# ----------------------------------------------------------------------------
# Pallas kernel 2: fused  LN2 + MLP (Linear/GELU/Linear) + residual,
# hidden dim tiled with an f32 accumulator.
# ----------------------------------------------------------------------------
def _mlp_residual_kernel(x_ref, g_ref, b_ref, w1_ref, b1_ref, w2_ref, b2_ref,
                         o_ref, ln_scr, acc_scr, *, eps, mm_dtype):
    k = pl.program_id(1)

    @pl.when(k == 0)
    def _():
        x = x_ref[...]                              # (tile, C) f32
        mean = jnp.mean(x, axis=-1, keepdims=True)
        xc = x - mean
        var = jnp.mean(xc * xc, axis=-1, keepdims=True)
        ln = xc * jax.lax.rsqrt(var + eps) * g_ref[0] + b_ref[0]
        ln_scr[...] = ln.astype(mm_dtype)           # cached for all hidden tiles
        acc_scr[...] = jnp.zeros_like(acc_scr)

    h = jnp.dot(ln_scr[...], w1_ref[...],
                preferred_element_type=jnp.float32) + b1_ref[0]
    h = _gelu_tanh(h)                               # f32 elementwise, tanh -> EUP
    acc_scr[...] += jnp.dot(h.astype(mm_dtype), w2_ref[...],
                            preferred_element_type=jnp.float32)

    @pl.when(k == pl.num_programs(1) - 1)
    def _():
        o_ref[...] = x_ref[...] + acc_scr[...] + b2_ref[0]


def _row_tiling(T, cap=256):
    """Pick a multiple-of-8 row tile. Prefer a divisor of T giving >=2 tiles;
    otherwise pad T up to a uniform tile (output sliced back by the caller)."""
    def best_div(limit):
        best = 0
        t = 8
        while t <= limit:
            if T % t == 0:
                best = t
            t += 8
        return best

    if T >= 16:
        b = best_div(min(cap, T // 2))
        if b:
            return b, T
    b = best_div(min(cap, T))
    if b:
        return b, T
    tile = min(cap, ((T + 7) // 8) * 8)
    Tp = ((T + tile - 1) // tile) * tile
    return tile, Tp


def _hidden_tile(Hd, cap=1024):
    """Largest multiple-of-128 divisor of Hd up to cap; Hd if none exists."""
    best = None
    t = 128
    while t <= min(Hd, cap):
        if Hd % t == 0:
            best = t
        t += 128
    return best if best is not None else Hd


def mlp_residual_pallas(x2d, gamma, beta, w1, b1, w2, b2, eps=LN_EPS):
    T, C = x2d.shape
    Hd = w1.shape[1]
    tile, Tp = _row_tiling(T)
    tHd = _hidden_tile(Hd)
    x_in = jnp.pad(x2d, ((0, Tp - T), (0, 0))) if Tp != T else x2d

    kernel = functools.partial(_mlp_residual_kernel, eps=eps, mm_dtype=w1.dtype)
    out = pl.pallas_call(
        kernel,
        out_shape=jax.ShapeDtypeStruct((Tp, C), jnp.float32),
        grid=(Tp // tile, Hd // tHd),
        in_specs=[
            pl.BlockSpec((tile, C), lambda i, k: (i, 0)),
            _const_spec((1, C), lambda i, k: (0, 0)),
            _const_spec((1, C), lambda i, k: (0, 0)),
            pl.BlockSpec((C, tHd), lambda i, k: (0, k)),
            pl.BlockSpec((1, tHd), lambda i, k: (0, k)),
            pl.BlockSpec((tHd, C), lambda i, k: (k, 0)),
            _const_spec((1, C), lambda i, k: (0, 0)),
        ],
        out_specs=pl.BlockSpec((tile, C), lambda i, k: (i, 0)),
        scratch_shapes=[pltpu.VMEM((tile, C), w1.dtype),      # cached LN (bf16)
                        pltpu.VMEM((tile, C), jnp.float32)],  # f32 accumulator
        compiler_params=pltpu.CompilerParams(
            dimension_semantics=("parallel", "arbitrary"),
            vmem_limit_bytes=VMEM_LIMIT),
    )(x_in, gamma.reshape(1, C), beta.reshape(1, C),
      w1, b1.reshape(1, Hd), w2, b2.reshape(1, C))
    return out[:T] if Tp != T else out


# ----------------------------------------------------------------------------
# window partition / reverse and shift-mask construction (layout glue, XLA)
# ----------------------------------------------------------------------------
def window_partition(x, ws):
    B, H, W, C = x.shape
    x = x.reshape(B, H // ws, ws, W // ws, ws, C)
    return x.transpose(0, 1, 3, 2, 4, 5).reshape(-1, ws, ws, C)


def window_reverse(windows, ws, H, W):
    B = windows.shape[0] // (H * W // ws // ws)
    x = windows.reshape(B, H // ws, W // ws, ws, ws, -1)
    return x.transpose(0, 1, 3, 2, 4, 5).reshape(B, H, W, -1)


def make_attn_mask(H, W, ws, ss):
    Hp = int(np.ceil(H / ws)) * ws
    Wp = int(np.ceil(W / ws)) * ws
    img_mask = np.zeros((1, Hp, Wp, 1), np.float32)
    h_slices = (slice(0, -ws), slice(-ws, -ss), slice(-ss, None))
    w_slices = (slice(0, -ws), slice(-ws, -ss), slice(-ss, None))
    cnt = 0
    for h in h_slices:
        for w in w_slices:
            img_mask[:, h, w, :] = cnt
            cnt += 1
    mw = img_mask.reshape(1, Hp // ws, ws, Wp // ws, ws, 1)
    mw = mw.transpose(0, 1, 3, 2, 4, 5).reshape(-1, ws * ws)
    am = mw[:, None, :] - mw[:, :, None]
    am = np.where(am != 0, -100.0, 0.0).astype(np.float32)
    return jnp.asarray(am)                          # (nW, N, N)


def relative_position_index(ws):
    coords = np.stack(np.meshgrid(np.arange(ws), np.arange(ws), indexing='ij'))
    cf = coords.reshape(2, -1)
    rel = cf[:, :, None] - cf[:, None, :]
    rel = rel.transpose(1, 2, 0).copy()
    rel[:, :, 0] += ws - 1
    rel[:, :, 1] += ws - 1
    rel[:, :, 0] *= 2 * ws - 1
    return rel.sum(-1)                              # (N, N) int


# ----------------------------------------------------------------------------
# one-time parameter preparation (q-scale fold + bf16 casts), hoisted out of
# the per-block forward path.
# ----------------------------------------------------------------------------
def prepare_block_params(p, dim, num_heads):
    scale = (dim // num_heads) ** (-0.5)
    q = dict(p)
    q['wqk'] = jnp.concatenate([p['wqk'][:, :dim] * scale, p['wqk'][:, dim:]],
                               axis=1).astype(MATMUL_DTYPE)
    q['bqk'] = jnp.concatenate([p['bqk'][:dim] * scale, p['bqk'][dim:]])
    q['wproj'] = p['wproj'].astype(MATMUL_DTYPE)
    q['w1'] = p['w1'].astype(MATMUL_DTYPE)
    q['w2'] = p['w2'].astype(MATMUL_DTYPE)
    return q


# ----------------------------------------------------------------------------
# CRF block forward (Pallas path)
# ----------------------------------------------------------------------------
def crf_block_pallas(x, v, H, W, p, ws, shift_size, num_heads, attn_mask):
    B, L, C = x.shape
    x_img = x.reshape(B, H, W, C)                   # pre-LN shortcut, image layout
    vv = v
    pad_b = (ws - H % ws) % ws
    pad_r = (ws - W % ws) % ws
    if pad_b or pad_r:
        x_img = jnp.pad(x_img, ((0, 0), (0, pad_b), (0, pad_r), (0, 0)))
        vv = jnp.pad(vv, ((0, 0), (0, pad_b), (0, pad_r), (0, 0)))
    Hp, Wp = H + pad_b, W + pad_r
    N = ws * ws
    nW = (Hp // ws) * (Wp // ws)

    if shift_size > 0:
        xs = jnp.roll(x_img, (-shift_size, -shift_size), axis=(1, 2))
        vs = jnp.roll(vv, (-shift_size, -shift_size), axis=(1, 2))
        mask = attn_mask                            # (nW, N, N), tiled per window
    else:
        xs, vs = x_img, vv
        mask = None                                 # mask skipped statically

    xw = window_partition(xs, ws).reshape(-1, N, C)                 # f32 shortcut
    vw = window_partition(vs, ws).reshape(-1, N, C).astype(MATMUL_DTYPE)

    valid = None
    if pad_b or pad_r:
        valid_img = jnp.pad(jnp.ones((1, H, W, 1), jnp.float32),
                            ((0, 0), (0, pad_b), (0, pad_r), (0, 0)))
        if shift_size > 0:
            valid_img = jnp.roll(valid_img, (-shift_size, -shift_size), axis=(1, 2))
        valid = window_partition(valid_img, ws).reshape(nW * N, 1)

    attn_res = fused_window_attention_pallas(
        xw, vw, p['relb'], mask, valid, p['ln1_g'], p['ln1_b'],
        p['wqk'], p['bqk'], p['wproj'], p['bproj'],
        num_heads, nW)                              # (nWB, N, C) = shortcut + attn

    xr = window_reverse(attn_res.reshape(-1, ws, ws, C), ws, Hp, Wp)
    if shift_size > 0:
        xr = jnp.roll(xr, (shift_size, shift_size), axis=(1, 2))
    x_new = xr[:, :H, :W, :].reshape(B, L, C)       # == shortcut + attn output

    x2d = mlp_residual_pallas(x_new.reshape(B * L, C),
                              p['ln2_g'], p['ln2_b'],
                              p['w1'], p['b1'], p['w2'], p['b2'])
    return x2d.reshape(B, L, C)


# ----------------------------------------------------------------------------
# pure-JAX reference (canonical PyTorch op order, f32)
# ----------------------------------------------------------------------------
def _ln_ref(x, g, b, eps=LN_EPS):
    m = x.mean(-1, keepdims=True)
    v = ((x - m) ** 2).mean(-1, keepdims=True)
    return (x - m) * jax.lax.rsqrt(v + eps) * g + b


def window_attention_ref(xw, vw, mask, relb, wqk, bqk, wproj, bproj, num_heads):
    nWB, N, C = xw.shape
    hd = C // num_heads
    scale = hd ** (-0.5)
    qk = xw @ wqk + bqk
    q = qk[..., :C].reshape(nWB, N, num_heads, hd).transpose(0, 2, 1, 3) * scale
    k = qk[..., C:].reshape(nWB, N, num_heads, hd).transpose(0, 2, 1, 3)
    vh = vw.reshape(nWB, N, num_heads, hd).transpose(0, 2, 1, 3)
    attn = jnp.einsum('bhnd,bhmd->bhnm', q, k) + relb[None]
    if mask is not None:
        attn = attn + mask[:, None]
    attn = jax.nn.softmax(attn, axis=-1)
    o = jnp.einsum('bhnm,bhmd->bhnd', attn, vh).transpose(0, 2, 1, 3).reshape(nWB, N, C)
    return o @ wproj + bproj


def crf_block_ref(x, v, H, W, p, ws, shift_size, num_heads, attn_mask):
    B, L, C = x.shape
    shortcut = x
    xn = _ln_ref(x, p['ln1_g'], p['ln1_b']).reshape(B, H, W, C)
    vv = v
    pad_b = (ws - H % ws) % ws
    pad_r = (ws - W % ws) % ws
    if pad_b or pad_r:
        xn = jnp.pad(xn, ((0, 0), (0, pad_b), (0, pad_r), (0, 0)))
        vv = jnp.pad(vv, ((0, 0), (0, pad_b), (0, pad_r), (0, 0)))
    Hp, Wp = H + pad_b, W + pad_r
    N = ws * ws
    if shift_size > 0:
        xs = jnp.roll(xn, (-shift_size, -shift_size), axis=(1, 2))
        vs = jnp.roll(vv, (-shift_size, -shift_size), axis=(1, 2))
        mask = jnp.tile(attn_mask, (B, 1, 1))
    else:
        xs, vs = xn, vv
        mask = None
    xw = window_partition(xs, ws).reshape(-1, N, C)
    vw = window_partition(vs, ws).reshape(-1, N, C)
    attn_out = window_attention_ref(xw, vw, mask, p['relb'], p['wqk'], p['bqk'],
                                    p['wproj'], p['bproj'], num_heads)
    xr = window_reverse(attn_out.reshape(-1, ws, ws, C), ws, Hp, Wp)
    if shift_size > 0:
        xr = jnp.roll(xr, (shift_size, shift_size), axis=(1, 2))
    xr = xr[:, :H, :W, :].reshape(B, L, C)
    x = shortcut + xr
    ln2 = _ln_ref(x, p['ln2_g'], p['ln2_b'])
    h = jax.nn.gelu(ln2 @ p['w1'] + p['b1'])        # tanh-approx GELU (jax default)
    return x + (h @ p['w2'] + p['b2'])


# ----------------------------------------------------------------------------
# BasicCRFLayer forward
# ----------------------------------------------------------------------------
def basic_crf_layer_forward(x, v, H, W, blocks, window_size, num_heads,
                            use_pallas=True):
    shift = window_size // 2
    attn_mask = make_attn_mask(H, W, window_size, shift)
    dim = x.shape[-1]
    if use_pallas:
        prepared = [prepare_block_params(p, dim, num_heads) for p in blocks]
    for i, p in enumerate(blocks):
        ss = 0 if i % 2 == 0 else shift
        if use_pallas:
            x = crf_block_pallas(x, v, H, W, prepared[i], window_size, ss,
                                 num_heads, attn_mask)
        else:
            x = crf_block_ref(x, v, H, W, p, window_size, ss, num_heads, attn_mask)
    # downsample is None -> (x, H, W, x, H, W)
    return x, H, W, x, H, W


# ----------------------------------------------------------------------------
# deterministic parameter construction (synthetic init; no checkpoint load)
# ----------------------------------------------------------------------------
def make_block_params(key, dim, num_heads, ws, mlp_ratio):
    hidden = int(dim * mlp_ratio)
    N = ws * ws
    std = 0.02
    k = jax.random.split(key, 9)
    table = jax.random.normal(k[0], ((2 * ws - 1) * (2 * ws - 1), num_heads),
                              jnp.float32) * std
    idx = relative_position_index(ws)
    relb = table[idx.reshape(-1)].reshape(N, N, num_heads).transpose(2, 0, 1)
    return dict(
        ln1_g=jnp.ones((dim,), jnp.float32),
        ln1_b=jnp.zeros((dim,), jnp.float32),
        wqk=jax.random.normal(k[1], (dim, 2 * dim), jnp.float32) * std,
        bqk=jax.random.normal(k[2], (2 * dim,), jnp.float32) * std,
        wproj=jax.random.normal(k[3], (dim, dim), jnp.float32) * std,
        bproj=jax.random.normal(k[4], (dim,), jnp.float32) * std,
        ln2_g=jnp.ones((dim,), jnp.float32),
        ln2_b=jnp.zeros((dim,), jnp.float32),
        w1=jax.random.normal(k[5], (dim, hidden), jnp.float32) * std,
        b1=jax.random.normal(k[6], (hidden,), jnp.float32) * std,
        w2=jax.random.normal(k[7], (hidden, dim), jnp.float32) * std,
        b2=jax.random.normal(k[8], (dim,), jnp.float32) * std,
        relb=jnp.asarray(relb, jnp.float32),
    )


# ----------------------------------------------------------------------------
if __name__ == "__main__":
    def run_case(B, H, W, dim, num_heads, window_size, depth, mlp_ratio, seed):
        key = jax.random.PRNGKey(seed)
        kx, kv, kp = jax.random.split(key, 3)
        x = jax.random.normal(kx, (B, H * W, dim), jnp.float32)   # (B, H*W, C)
        v = jax.random.normal(kv, (B, H, W, dim), jnp.float32)    # NHWC
        blk_keys = jax.random.split(kp, depth)
        blocks = [make_block_params(blk_keys[i], dim, num_heads, window_size,
                                    mlp_ratio) for i in range(depth)]
        out, *_ = basic_crf_layer_forward(x, v, H, W, blocks, window_size,
                                          num_heads, use_pallas=True)
        out = jax.block_until_ready(out)
        ref, *_ = basic_crf_layer_forward(x, v, H, W, blocks, window_size,
                                          num_heads, use_pallas=False)
        ref = jax.block_until_ready(ref)
        assert out.shape == (B, H * W, dim)
        err = float(jnp.max(jnp.abs(out - ref)))
        ok = bool(jnp.isfinite(out).all()) and err <= 2e-2
        return ok, err

    # case 1: no padding, block 0 un-shifted + block 1 shifted (mask path)
    ok1, err1 = run_case(B=2, H=8, W=8, dim=32, num_heads=2,
                         window_size=4, depth=2, mlp_ratio=4.0, seed=0)
    # case 2: H, W not divisible by window -> spatial padding + valid-mask path
    ok2, err2 = run_case(B=1, H=6, W=6, dim=32, num_heads=2,
                         window_size=4, depth=2, mlp_ratio=4.0, seed=1)

    if not (ok1 and ok2):
        raise SystemExit(f"Pallas/reference mismatch: err1={err1}, err2={err2}")
    print("KERNEL_OK")
</pallas_src>

<mosaic_0001>
module attributes {stable_mosaic.version = 11 : i64} {
  func.func @k(%arg0: i32, %arg1: memref<8x128xf32, #tpu.memory_space<vmem>>, %arg2: memref<8x128xf32, #tpu.memory_space<vmem>>, %arg3: memref<8x128xf32, #tpu.memory_space<vmem>>) attributes {dimension_semantics = [#tpu.dimension_semantics<arbitrary>], iteration_bounds = array<i64: 2>, scalar_prefetch = 0 : i64, scratch_operands = 0 : i64, tpu.core_type = #tpu.core_type<tc>, window_params = [{pipeline_mode = #tpu.pipeline_mode<synchronous>, transform_indices = @transform_0, window_bounds = array<i64: 8, 128>}, {transform_indices = @transform_1, window_bounds = array<i64: 8, 128>}, {transform_indices = @transform_2, window_bounds = array<i64: 8, 128>}]} {
    %c0 = arith.constant 0 : index
    %c0_0 = arith.constant 0 : index
    %0 = vector.load %arg2[%c0, %c0_0] : memref<8x128xf32, #tpu.memory_space<vmem>>, vector<8x128xf32>
    %c0_1 = arith.constant 0 : index
    %c0_2 = arith.constant 0 : index
    %1 = vector.load %arg1[%c0_1, %c0_2] : memref<8x128xf32, #tpu.memory_space<vmem>>, vector<8x128xf32>
    %2 = arith.addf %0, %1 : vector<8x128xf32>
    %c0_3 = arith.constant 0 : index
    %c0_4 = arith.constant 0 : index
    %3 = vector.load %arg3[%c0_3, %c0_4] : memref<8x128xf32, #tpu.memory_space<vmem>>, vector<8x128xf32>
    tpu.vector_store %arg3[%c0_3, %c0_4], %2 {strides = array<i32>} : memref<8x128xf32, #tpu.memory_space<vmem>>, vector<8x128xf32>,
    return
  }
  func.func @transform_0(%arg0: i32) -> (i32, i32) {
    %c0_i32 = arith.constant 0 : i32
    %c0_i32_0 = arith.constant 0 : i32
    %c0_i32_1 = arith.constant 0 : i32
    return %c0_i32, %c0_i32_0 : i32, i32
  }
  func.func @transform_1(%arg0: i32) -> (i32, i32) {
    %c0_i32 = arith.constant 0 : i32
    %c0_i32_0 = arith.constant 0 : i32
    return %arg0, %c0_i32 : i32, i32
  }
  func.func @transform_2(%arg0: i32) -> (i32, i32) {
    %c0_i32 = arith.constant 0 : i32
    %c0_i32_0 = arith.constant 0 : i32
    return %arg0, %c0_i32 : i32, i32
  }
}

module attributes {stable_mosaic.version = 11 : i64} {
  func.func @_fused_window_attn_kernel(%arg0: i32, %arg1: i32, %arg2: memref<2x16x32xf32, #tpu.memory_space<vmem>>, %arg3: memref<2x16x32xbf16, #tpu.memory_space<vmem>>, %arg4: memref<2x16x16xf32, #tpu.memory_space<vmem>>, %arg5: memref<1x32xf32, #tpu.memory_space<vmem>>, %arg6: memref<1x32xf32, #tpu.memory_space<vmem>>, %arg7: memref<32x64xbf16, #tpu.memory_space<vmem>>, %arg8: memref<1x64xf32, #tpu.memory_space<vmem>>, %arg9: memref<32x32xbf16, #tpu.memory_space<vmem>>, %arg10: memref<1x32xf32, #tpu.memory_space<vmem>>, %arg11: memref<2x16x32xf32, #tpu.memory_space<vmem>>, %arg12: memref<32x32xbf16, #tpu.memory_space<vmem>>) attributes {dimension_semantics = [#tpu.dimension_semantics<parallel>, #tpu.dimension_semantics<parallel>], iteration_bounds = array<i64: 2, 2>, scalar_prefetch = 0 : i64, scratch_operands = 1 : i64, tpu.core_type = #tpu.core_type<tc>, window_params = [{transform_indices = @transform_0, window_bounds = array<i64: 2, 16, 32>}, {transform_indices = @transform_1, window_bounds = array<i64: 2, 16, 32>}, {pipeline_mode = #tpu.pipeline_mode<synchronous>, transform_indices = @transform_2, window_bounds = array<i64: 2, 16, 16>}, {pipeline_mode = #tpu.pipeline_mode<synchronous>, transform_indices = @transform_3, window_bounds = array<i64: 1, 32>}, {pipeline_mode = #tpu.pipeline_mode<synchronous>, transform_indices = @transform_4, window_bounds = array<i64: 1, 32>}, {pipeline_mode = #tpu.pipeline_mode<synchronous>, transform_indices = @transform_5, window_bounds = array<i64: 32, 64>}, {pipeline_mode = #tpu.pipeline_mode<synchronous>, transform_indices = @transform_6, window_bounds = array<i64: 1, 64>}, {pipeline_mode = #tpu.pipeline_mode<synchronous>, transform_indices = @transform_7, window_bounds = array<i64: 32, 32>}, {pipeline_mode = #tpu.pipeline_mode<synchronous>, transform_indices = @transform_8, window_bounds = array<i64: 1, 32>}, {transform_indices = @transform_9, window_bounds = array<i64: 2, 16, 32>}]} {
    %c0 = arith.constant 0 : index
    %c0_0 = arith.constant 0 : index
    %c0_1 = arith.constant 0 : index
    %0 = vector.load %arg2[%c0, %c0_0, %c0_1] : memref<2x16x32xf32, #tpu.memory_space<vmem>>, vector<2x16x32xf32>
    %1 = vector.shape_cast %0 : vector<2x16x32xf32> to vector<32x32xf32>
    %cst = arith.constant dense<0.000000e+00> : vector<32xf32>
    %2 = vector.multi_reduction <add>, %1, %cst [1] : vector<32x32xf32> to vector<32xf32>
    %3 = vector.shape_cast %2 : vector<32xf32> to vector<32x1xf32>
    %cst_2 = arith.constant 3.200000e+01 : f32
    %4 = vector.broadcast %cst_2 : f32 to vector<32x1xf32>
    %5 = arith.divf %3, %4 : vector<32x1xf32>
    %6 = vector.broadcast %5 : vector<32x1xf32> to vector<32x32xf32>
    %7 = arith.subf %1, %6 : vector<32x32xf32>
    %8 = arith.mulf %7, %7 : vector<32x32xf32>
    %cst_3 = arith.constant dense<0.000000e+00> : vector<32xf32>
    %9 = vector.multi_reduction <add>, %8, %cst_3 [1] : vector<32x32xf32> to vector<32xf32>
    %10 = vector.shape_cast %9 : vector<32xf32> to vector<32x1xf32>
    %cst_4 = arith.constant 3.200000e+01 : f32
    %11 = vector.broadcast %cst_4 : f32 to vector<32x1xf32>
    %12 = arith.divf %10, %11 : vector<32x1xf32>
    %cst_5 = arith.constant 9.99999974E-6 : f32
    %13 = vector.broadcast %cst_5 : f32 to vector<32x1xf32>
    %14 = arith.addf %12, %13 : vector<32x1xf32>
    %15 = math.rsqrt %14 : vector<32x1xf32>
    %16 = vector.broadcast %15 : vector<32x1xf32> to vector<32x32xf32>
    %17 = arith.mulf %7, %16 : vector<32x32xf32>
    %c0_6 = arith.constant 0 : index
    %c0_7 = arith.constant 0 : index
    %18 = vector.load %arg5[%c0_6, %c0_7] : memref<1x32xf32, #tpu.memory_space<vmem>>, vector<1x32xf32>
    %19 = vector.shape_cast %18 : vector<1x32xf32> to vector<32xf32>
    %20 = vector.shape_cast %19 : vector<32xf32> to vector<1x32xf32>
    %21 = vector.broadcast %20 : vector<1x32xf32> to vector<32x32xf32>
    %22 = arith.mulf %17, %21 : vector<32x32xf32>
    %c0_8 = arith.constant 0 : index
    %c0_9 = arith.constant 0 : index
    %23 = vector.load %arg6[%c0_8, %c0_9] : memref<1x32xf32, #tpu.memory_space<vmem>>, vector<1x32xf32>
    %24 = vector.shape_cast %23 : vector<1x32xf32> to vector<32xf32>
    %25 = vector.shape_cast %24 : vector<32xf32> to vector<1x32xf32>
    %26 = vector.broadcast %25 : vector<1x32xf32> to vector<32x32xf32>
    %27 = arith.addf %22, %26 : vector<32x32xf32>
    %28 = arith.truncf %27 : vector<32x32xf32> to vector<32x32xbf16>
    %c0_10 = arith.constant 0 : index
    %c0_11 = arith.constant 0 : index
    %29 = vector.load %arg7[%c0_10, %c0_11] : memref<32x64xbf16, #tpu.memory_space<vmem>>, vector<32x64xbf16>
    %cst_12 = arith.constant dense<0.000000e+00> : vector<32x64xf32>
    %30 = tpu.matmul %28, %29, %cst_12 {dimension_numbers = #tpu.dot_dimension_numbers<[1], [0], [0], [1], [0, 0, 1, 1], [], []>} : vector<32x32xbf16>, vector<32x64xbf16>, vector<32x64xf32> -> vector<32x64xf32>
    %c0_13 = arith.constant 0 : index
    %c0_14 = arith.constant 0 : index
    %31 = vector.load %arg8[%c0_13, %c0_14] : memref<1x64xf32, #tpu.memory_space<vmem>>, vector<1x64xf32>
    %32 = vector.shape_cast %31 : vector<1x64xf32> to vector<64xf32>
    %33 = vector.shape_cast %32 : vector<64xf32> to vector<1x64xf32>
    %34 = vector.broadcast %33 : vector<1x64xf32> to vector<32x64xf32>
    %35 = arith.addf %30, %34 : vector<32x64xf32>
    %36 = vector.extract_strided_slice %35 {offsets = [0, 0], sizes = [32, 32], strides = [1, 1]} : vector<32x64xf32> to vector<32x32xf32>
    %37 = vector.shape_cast %36 : vector<32x32xf32> to vector<2x16x32xf32>
    %38 = vector.extract_strided_slice %35 {offsets = [0, 32], sizes = [32, 32], strides = [1, 1]} : vector<32x64xf32> to vector<32x32xf32>
    %39 = vector.shape_cast %38 : vector<32x32xf32> to vector<2x16x32xf32>
    %c0_15 = arith.constant 0 : index
    %c0_16 = arith.constant 0 : index
    %c0_17 = arith.constant 0 : index
    %40 = vector.load %arg3[%c0_15, %c0_16, %c0_17] : memref<2x16x32xbf16, #tpu.memory_space<vmem>>, vector<2x16x32xbf16>
    %41 = vector.extract_strided_slice %37 {offsets = [0, 0, 0], sizes = [2, 16, 16], strides = [1, 1, 1]} : vector<2x16x32xf32> to vector<2x16x16xf32>
    %42 = arith.truncf %41 : vector<2x16x16xf32> to vector<2x16x16xbf16>
    %43 = vector.extract_strided_slice %39 {offsets = [0, 0, 0], sizes = [2, 16, 16], strides = [1, 1, 1]} : vector<2x16x32xf32> to vector<2x16x16xf32>
    %44 = arith.truncf %43 : vector<2x16x16xf32> to vector<2x16x16xbf16>
    "tpu.trace_start"() <{level = 10 : i32, message = "wnd,wmd->wnm"}> : () -> ()
    %cst_18 = arith.constant dense<0.000000e+00> : vector<2x16x16xf32>
    %45 = tpu.matmul %42, %44, %cst_18 {dimension_numbers = #tpu.dot_dimension_numbers<[2], [2], [1], [1], [0, 0, 0, 1, 1, 1], [0], [0]>} : vector<2x16x16xbf16>, vector<2x16x16xbf16>, vector<2x16x16xf32> -> vector<2x16x16xf32>
    "tpu.trace_stop"() : () -> ()
    %c0_19 = arith.constant 0 : index
    %c0_20 = arith.constant 0 : index
    %c0_21 = arith.constant 0 : index
    %46 = vector.load %arg4[%c0_19, %c0_20, %c0_21] : memref<2x16x16xf32, #tpu.memory_space<vmem>>, vector<1x16x16xf32>
    %47 = vector.shape_cast %46 : vector<1x16x16xf32> to vector<16x16xf32>
    %48 = vector.shape_cast %47 : vector<16x16xf32> to vector<1x16x16xf32>
    %49 = vector.broadcast %48 : vector<1x16x16xf32> to vector<2x16x16xf32>
    %50 = arith.addf %45, %49 : vector<2x16x16xf32>
    %cst_22 = arith.constant dense<0xFF800000> : vector<2x16xf32>
    %51 = vector.multi_reduction <maximumf>, %50, %cst_22 [2] : vector<2x16x16xf32> to vector<2x16xf32>
    %52 = vector.shape_cast %51 : vector<2x16xf32> to vector<2x16x1xf32>
    %53 = vector.broadcast %52 : vector<2x16x1xf32> to vector<2x16x16xf32>
    %54 = arith.subf %50, %53 : vector<2x16x16xf32>
    %55 = math.exp %54 : vector<2x16x16xf32>
    %cst_23 = arith.constant dense<0.000000e+00> : vector<2x16xf32>
    %56 = vector.multi_reduction <add>, %55, %cst_23 [2] : vector<2x16x16xf32> to vector<2x16xf32>
    %57 = vector.shape_cast %56 : vector<2x16xf32> to vector<2x16x1xf32>
    %58 = tpu.reciprocal %57 {approx = true} : vector<2x16x1xf32> -> vector<2x16x1xf32>
    %59 = vector.broadcast %58 : vector<2x16x1xf32> to vector<2x16x16xf32>
    %60 = arith.mulf %55, %59 : vector<2x16x16xf32>
    %61 = arith.truncf %60 : vector<2x16x16xf32> to vector<2x16x16xbf16>
    %62 = vector.extract_strided_slice %40 {offsets = [0, 0, 0], sizes = [2, 16, 16], strides = [1, 1, 1]} : vector<2x16x32xbf16> to vector<2x16x16xbf16>
    "tpu.trace_start"() <{level = 10 : i32, message = "wnm,wmd->wnd"}> : () -> ()
    %cst_24 = arith.constant dense<0.000000e+00> : vector<2x16x16xf32>
    %63 = tpu.matmul %61, %62, %cst_24 {dimension_numbers = #tpu.dot_dimension_numbers<[2], [1], [1], [2], [0, 0, 0, 1, 1, 2], [0], [0]>} : vector<2x16x16xbf16>, vector<2x16x16xbf16>, vector<2x16x16xf32> -> vector<2x16x16xf32>
    "tpu.trace_stop"() : () -> ()
    %64 = vector.shape_cast %63 : vector<2x16x16xf32> to vector<32x16xf32>
    %65 = arith.truncf %64 : vector<32x16xf32> to vector<32x16xbf16>
    %c0_25 = arith.constant 0 : index
    %c0_26 = arith.constant 0 : index
    %66 = vector.load %arg12[%c0_25, %c0_26] : memref<32x32xbf16, #tpu.memory_space<vmem>>, vector<32x16xbf16>
    tpu.vector_store %arg12[%c0_25, %c0_26], %65 {strides = array<i32>} : memref<32x32xbf16, #tpu.memory_space<vmem>>, vector<32x16xbf16>,
    %67 = vector.extract_strided_slice %37 {offsets = [0, 0, 16], sizes = [2, 16, 16], strides = [1, 1, 1]} : vector<2x16x32xf32> to vector<2x16x16xf32>
    %68 = arith.truncf %67 : vector<2x16x16xf32> to vector<2x16x16xbf16>
    %69 = vector.extract_strided_slice %39 {offsets = [0, 0, 16], sizes = [2, 16, 16], strides = [1, 1, 1]} : vector<2x16x32xf32> to vector<2x16x16xf32>
    %70 = arith.truncf %69 : vector<2x16x16xf32> to vector<2x16x16xbf16>
    "tpu.trace_start"() <{level = 10 : i32, message = "wnd,wmd->wnm"}> : () -> ()
    %cst_27 = arith.constant dense<0.000000e+00> : vector<2x16x16xf32>
    %71 = tpu.matmul %68, %70, %cst_27 {dimension_numbers = #tpu.dot_dimension_numbers<[2], [2], [1], [1], [0, 0, 0, 1, 1, 1], [0], [0]>} : vector<2x16x16xbf16>, vector<2x16x16xbf16>, vector<2x16x16xf32> -> vector<2x16x16xf32>
    "tpu.trace_stop"() : () -> ()
    %c1 = arith.constant 1 : index
    %c0_28 = arith.constant 0 : index
    %c0_29 = arith.constant 0 : index
    %72 = vector.load %arg4[%c1, %c0_28, %c0_29] : memref<2x16x16xf32, #tpu.memory_space<vmem>>, vector<1x16x16xf32>
    %73 = vector.shape_cast %72 : vector<1x16x16xf32> to vector<16x16xf32>
    %74 = vector.shape_cast %73 : vector<16x16xf32> to vector<1x16x16xf32>
    %75 = vector.broadcast %74 : vector<1x16x16xf32> to vector<2x16x16xf32>
    %76 = arith.addf %71, %75 : vector<2x16x16xf32>
    %cst_30 = arith.constant dense<0xFF800000> : vector<2x16xf32>
    %77 = vector.multi_reduction <maximumf>, %76, %cst_30 [2] : vector<2x16x16xf32> to vector<2x16xf32>
    %78 = vector.shape_cast %77 : vector<2x16xf32> to vector<2x16x1xf32>
    %79 = vector.broadcast %78 : vector<2x16x1xf32> to vector<2x16x16xf32>
    %80 = arith.subf %76, %79 : vector<2x16x16xf32>
    %81 = math.exp %80 : vector<2x16x16xf32>
    %cst_31 = arith.constant dense<0.000000e+00> : vector<2x16xf32>
    %82 = vector.multi_reduction <add>, %81, %cst_31 [2] : vector<2x16x16xf32> to vector<2x16xf32>
    %83 = vector.shape_cast %82 : vector<2x16xf32> to vector<2x16x1xf32>
    %84 = tpu.reciprocal %83 {approx = true} : vector<2x16x1xf32> -> vector<2x16x1xf32>
    %85 = vector.broadcast %84 : vector<2x16x1xf32> to vector<2x16x16xf32>
    %86 = arith.mulf %81, %85 : vector<2x16x16xf32>
    %87 = arith.truncf %86 : vector<2x16x16xf32> to vector<2x16x16xbf16>
    %88 = vector.extract_strided_slice %40 {offsets = [0, 0, 16], sizes = [2, 16, 16], strides = [1, 1, 1]} : vector<2x16x32xbf16> to vector<2x16x16xbf16>
    "tpu.trace_start"() <{level = 10 : i32, message = "wnm,wmd->wnd"}> : () -> ()
    %cst_32 = arith.constant dense<0.000000e+00> : vector<2x16x16xf32>
    %89 = tpu.matmul %87, %88, %cst_32 {dimension_numbers = #tpu.dot_dimension_numbers<[2], [1], [1], [2], [0, 0, 0, 1, 1, 2], [0], [0]>} : vector<2x16x16xbf16>, vector<2x16x16xbf16>, vector<2x16x16xf32> -> vector<2x16x16xf32>
    "tpu.trace_stop"() : () -> ()
    %90 = vector.shape_cast %89 : vector<2x16x16xf32> to vector<32x16xf32>
    %91 = arith.truncf %90 : vector<32x16xf32> to vector<32x16xbf16>
    %c0_33 = arith.constant 0 : index
    %c16 = arith.constant 16 : index
    %92 = vector.load %arg12[%c0_33, %c16] : memref<32x32xbf16, #tpu.memory_space<vmem>>, vector<32x16xbf16>
    tpu.vector_store %arg12[%c0_33, %c16], %91 {strides = array<i32>} : memref<32x32xbf16, #tpu.memory_space<vmem>>, vector<32x16xbf16>,
    %c0_34 = arith.constant 0 : index
    %c0_35 = arith.constant 0 : index
    %93 = vector.load %arg12[%c0_34, %c0_35] : memref<32x32xbf16, #tpu.memory_space<vmem>>, vector<32x32xbf16>
    %c0_36 = arith.constant 0 : index
    %c0_37 = arith.constant 0 : index
    %94 = vector.load %arg9[%c0_36, %c0_37] : memref<32x32xbf16, #tpu.memory_space<vmem>>, vector<32x32xbf16>
    %cst_38 = arith.constant dense<0.000000e+00> : vector<32x32xf32>
    %95 = tpu.matmul %93, %94, %cst_38 {dimension_numbers = #tpu.dot_dimension_numbers<[1], [0], [0], [1], [0, 0, 1, 1], [], []>} : vector<32x32xbf16>, vector<32x32xbf16>, vector<32x32xf32> -> vector<32x32xf32>
    %96 = arith.addf %1, %95 : vector<32x32xf32>
    %c0_39 = arith.constant 0 : index
    %c0_40 = arith.constant 0 : index
    %97 = vector.load %arg10[%c0_39, %c0_40] : memref<1x32xf32, #tpu.memory_space<vmem>>, vector<1x32xf32>
    %98 = vector.shape_cast %97 : vector<1x32xf32> to vector<32xf32>
    %99 = vector.shape_cast %98 : vector<32xf32> to vector<1x32xf32>
    %100 = vector.broadcast %99 : vector<1x32xf32> to vector<32x32xf32>
    %101 = arith.addf %96, %100 : vector<32x32xf32>
    %102 = vector.shape_cast %101 : vector<32x32xf32> to vector<2x16x32xf32>
    %c0_41 = arith.constant 0 : index
    %c0_42 = arith.constant 0 : index
    %c0_43 = arith.constant 0 : index
    %103 = vector.load %arg11[%c0_41, %c0_42, %c0_43] : memref<2x16x32xf32, #tpu.memory_space<vmem>>, vector<2x16x32xf32>
    tpu.vector_store %arg11[%c0_41, %c0_42, %c0_43], %102 {strides = array<i32>} : memref<2x16x32xf32, #tpu.memory_space<vmem>>, vector<2x16x32xf32>,
    return
  }
  func.func @transform_0(%arg0: i32, %arg1: i32) -> (i32, i32, i32) {
    %c2_i32 = arith.constant 2 : i32
    %0 = arith.muli %arg0, %c2_i32 : i32
    %1 = arith.addi %0, %arg1 : i32
    %c0_i32 = arith.constant 0 : i32
    %c0_i32_0 = arith.constant 0 : i32
    %c0_i32_1 = arith.constant 0 : i32
    return %1, %c0_i32, %c0_i32_0 : i32, i32, i32
  }
  func.func @transform_1(%arg0: i32, %arg1: i32) -> (i32, i32, i32) {
    %c2_i32 = arith.constant 2 : i32
    %0 = arith.muli %arg0, %c2_i32 : i32
    %1 = arith.addi %0, %arg1 : i32
    %c0_i32 = arith.constant 0 : i32
    %c0_i32_0 = arith.constant 0 : i32
    %c0_i32_1 = arith.constant 0 : i32
    return %1, %c0_i32, %c0_i32_0 : i32, i32, i32
  }
  func.func @transform_2(%arg0: i32, %arg1: i32) -> (i32, i32, i32) {
    %c0_i32 = arith.constant 0 : i32
    %c0_i32_0 = arith.constant 0 : i32
    %c0_i32_1 = arith.constant 0 : i32
    %c0_i32_2 = arith.constant 0 : i32
    return %c0_i32, %c0_i32_0, %c0_i32_1 : i32, i32, i32
  }
  func.func @transform_3(%arg0: i32, %arg1: i32) -> (i32, i32) {
    %c0_i32 = arith.constant 0 : i32
    %c0_i32_0 = arith.constant 0 : i32
    %c0_i32_1 = arith.constant 0 : i32
    return %c0_i32, %c0_i32_0 : i32, i32
  }
  func.func @transform_4(%arg0: i32, %arg1: i32) -> (i32, i32) {
    %c0_i32 = arith.constant 0 : i32
    %c0_i32_0 = arith.constant 0 : i32
    %c0_i32_1 = arith.constant 0 : i32
    return %c0_i32, %c0_i32_0 : i32, i32
  }
  func.func @transform_5(%arg0: i32, %arg1: i32) -> (i32, i32) {
    %c0_i32 = arith.constant 0 : i32
    %c0_i32_0 = arith.constant 0 : i32
    %c0_i32_1 = arith.constant 0 : i32
    return %c0_i32, %c0_i32_0 : i32, i32
  }
  func.func @transform_6(%arg0: i32, %arg1: i32) -> (i32, i32) {
    %c0_i32 = arith.constant 0 : i32
    %c0_i32_0 = arith.constant 0 : i32
    %c0_i32_1 = arith.constant 0 : i32
    return %c0_i32, %c0_i32_0 : i32, i32
  }
  func.func @transform_7(%arg0: i32, %arg1: i32) -> (i32, i32) {
    %c0_i32 = arith.constant 0 : i32
    %c0_i32_0 = arith.constant 0 : i32
    %c0_i32_1 = arith.constant 0 : i32
    return %c0_i32, %c0_i32_0 : i32, i32
  }
  func.func @transform_8(%arg0: i32, %arg1: i32) -> (i32, i32) {
    %c0_i32 = arith.constant 0 : i32
    %c0_i32_0 = arith.constant 0 : i32
    %c0_i32_1 = arith.constant 0 : i32
    return %c0_i32, %c0_i32_0 : i32, i32
  }
  func.func @transform_9(%arg0: i32, %arg1: i32) -> (i32, i32, i32) {
    %c2_i32 = arith.constant 2 : i32
    %0 = arith.muli %arg0, %c2_i32 : i32
    %1 = arith.addi %0, %arg1 : i32
    %c0_i32 = arith.constant 0 : i32
    %c0_i32_0 = arith.constant 0 : i32
    %c0_i32_1 = arith.constant 0 : i32
    return %1, %c0_i32, %c0_i32_0 : i32, i32, i32
  }
}

</mosaic_0001>

<bundles_post_ra>
// kernel: tpu_custom_call.1
= control target key start
LH: loop header
LB: loop body
LE: loop exit
PB: predicated region body
PF: predicated region fallthrough
CT: control target
= control target key end

     0   :  { %7 = vsyncpa [#allocation3], 0  ;;  %s692_s0 = inlined_call_operand.hbm [shape: f32[8,128], index: 0, kind: input, shape index: {}]   ;;  %s693_s1 = inlined_call_operand.hbm [shape: f32[16,128], index: 1, kind: input, shape index: {}]   ;;  %s694_s2 = inlined_call_operand.hbm [shape: f32[16,128], index: 2, kind: output, shape index: {}]  }
   0x1   :  { %8 = vsyncpa [#allocation6], 0 }
   0x2   :  { %10 = vsyncpa [#allocation6 + $0x1], 0 }
   0x3   :  { %11 = vsyncpa [#allocation4], 0 }
   0x4   :  { %13 = vsyncpa [#allocation4 + $0x1], 0  ;;  %s491_s9 = smov 0   ;;  %s493_s10 = smov 0  }
   0x5   :  { %s495_s11 = smov 0   ;;  %s497_s12 = smov 0  }
   0x6 LB: > { %s512_s13 = sadd.s32 4294967295, %s471_s12   ;;  %s272_s14 = sadd.s32 4294967294, %s471_s12   ;;  %s471_s12 = sphi %s497_s12, %s718_s12   ;;  %s467_s11 = sphi %s495_s11, %s717_s11   ;;  %s463_s10 = sphi %s493_s10, %s716_s10   ;;  %s459_s9 = sphi %s491_s9, %s715_s9  }
   0x7   : > { %p60_p0 = scmp.ne.s32.totalorder %s463_s10, %s459_s9  ;;  %p695_p1 = scmp.eq.s32.totalorder %s512_s13, 0 }
   0x8   : > { %p90_p3 = scmp.eq.s32.totalorder %s272_s14, 1  ;;  %p273_p5 = scmp.ge.s32.totalorder %s471_s12, 1 }
   0x9   : > { %p521_p4 = por %p695_p1, %p60_p0  ;;  %p97_p7 = scmp.lt.s32.totalorder %s471_s12, 3 }
   0xa   : > { %p526_p6 = por %p90_p3, %p60_p0  ;;  %s473_s18 = smov [#allocation2]  }
   0xb   : > { %s698_s15 = scalar_select %p521_p4, 1, 0 }
   0xc   : > { %s699_s16 = scalar_select %p526_p6, 1, 0 }
   0xd   : > { %p531_p8 = pnand %p273_p5, %p97_p7  ;;  %s110_s19 = sshll.u32 %s473_s18, 4  ;;  %s111_s19 = int_to_ptr.vmem [resolvable:$true] %s110_s19 }
   0xe   : > { %s539_s20 = sadd.s32 1, %s471_s12   ;;  %s47_s24 = sadd.s32 1, %s467_s11 }
   0xf   : > { %s700_s17 = scalar_select %p531_p8, 1, 0 }
  0x10   : > { %p294_p10 = pneg %p531_p8  ;;  %s44_s22 = ssub.s32 %s471_s12, %s539_s20 }
  0x11   : > { %p549_p12 = scmp.eq.s32.totalorder %s44_s22, 0  ;;  %s343_s27 = scalar_lea.hbm %s692_s0, 128 }
  0x12   : > { %p543_p11 = pnand %p294_p10, %p695_p1  ;;  %p344_p0 = scmp.ne.s32.totalorder %s692_s0, %s343_s27 }
  0x13   : > { %s702_s23 = scalar_select %p549_p12, 1, 0 }
  0x14   : > { %p345_p3 = pneg %p543_p11  ;;  %p350_p10 = scmp.lt.u32.totalorder %s343_s27, %s692_s0 }
  0x16   : > { %p346_p5 = pnand %p345_p3, %p344_p0 }
  0x18   : > { %p347_p7 = pneg %p346_p5 }
  0x1a   : > { %p352_p9 = pnand %p350_p10, %p347_p7 }
  0x1c   : > { %355 = shalt.err (!%p352_p9)
}
  0x1d   : > { %s356_s4 = scalar_lea.vmem %s111_s19, 128  ;;  %p364_p6 = scmp.lt.s32.totalorder %s111_s19, %s111_s19 }
  0x1e   : > { %p357_p1 = scmp.ne.s32.totalorder %s111_s19, %s356_s4  ;;  %p365_p4 = scmp.lt.s32.totalorder %s356_s4, %s356_s4 }
  0x20   : > { %p359_p2 = pnand %p357_p1, %p345_p3  ;;  %p366_p8 = por %p365_p4, %p364_p6 }
  0x22   : > { %p360_p13 = pneg %p359_p2 }
  0x24   : > { %p367_p12 = pnand %p366_p8, %p360_p13 }
  0x26   : > { %370 = shalt.err (!%p367_p12)
}
  0x27   : > { %297 = dma.hbm_to_vmem [thread:$0]  (!%p543_p11), %s692_s0, 128, %s111_s19, [#allocation3]  }
  0x28   : > { %p703_p1 = scmp.ne.s32.totalorder %s702_s23, 0  ;;  %p55_p2 = scmp.eq.s32.totalorder %s471_s12, 0 }
  0x29   : > { %p704_p4 = scmp.ne.s32.totalorder %s467_s11, %s463_s10  ;;  %p705_p6 = scmp.eq.s32.totalorder %s512_s13, 1 }
  0x2a   : > { %s575_s7 = scalar_select %p703_p1, %s467_s11, %s47_s24  }
  0x2b   : > { %p583_p8 = por %p705_p6, %p704_p4  ;;  %p307_p9 = scmp.lt.s32.totalorder %s471_s12, 2 }
  0x2c   : > { %s121_s14 = sand.u32 1, %s467_s11   ;;  %p707_p12 = pmov %p704_p4 }
  0x2d   : > { %s276_s18 = sshll.u32 %s121_s14, 3  ;;  %s277_s21 = sshll.u32 %s471_s12, 7 }
  0x2e   : > { %p56_p13 = por %p55_p2, %p707_p12  ;;  %s596_s19 = scalar_lea.hbm %s693_s1, %s277_s21 }
  0x2f   : > { %s125_s23 = scalar_lea.vmem [#allocation5], %s276_s18  ;;  %s122_s27 = scalar_lea.sflag [#allocation6], %s121_s14 }
  0x30   : > { %s132_s24 = sshll.u32 %s125_s23, 4  ;;  %p598_p11 = pnand %p307_p9, %p56_p13  ;;  %s602_s24 = int_to_ptr.vmem [resolvable:$true] %s132_s24 }
  0x31   : > { %s371_s28 = scalar_lea.hbm %s596_s19, 128  ;;  %s376_s3 = scalar_lea.hbm %s693_s1, 256 }
  0x32   : > { %p372_p0 = scmp.ne.s32.totalorder %s596_s19, %s371_s28  ;;  %p373_p3 = pneg %p598_p11 }
  0x33   : > { %p377_p10 = scmp.lt.u32.totalorder %s596_s19, %s693_s1  ;;  %p378_p1 = scmp.lt.u32.totalorder %s376_s3, %s371_s28 }
  0x34   : > { %p374_p5 = pnand %p373_p3, %p372_p0  ;;  %p380_p4 = scmp.lt.u32.totalorder %s371_s28, %s596_s19 }
  0x35   : > { %p379_p2 = por %p378_p1, %p377_p10 }
  0x36   : > { %p375_p7 = pneg %p374_p5 }
  0x37   : > { %p381_p6 = por %p380_p4, %p379_p2 }
  0x39   : > { %p382_p9 = pnand %p381_p6, %p375_p7 }
  0x3b   : > { %385 = shalt.err (!%p382_p9)
}
  0x3c   : > { %s386_s6 = scalar_lea.vmem %s602_s24, 128  ;;  %s474_s14 = smov [#allocation5]  }
  0x3d   : > { %p387_p12 = scmp.ne.s32.totalorder %s602_s24, %s386_s6  ;;  %s391_s18 = sshll.u32 %s474_s14, 4  ;;  %s392_s18 = int_to_ptr.vmem [resolvable:$false] %s391_s18 }
  0x3e   : > { %s393_s21 = scalar_lea.vmem %s392_s18, 256  ;;  %p394_p5 = scmp.lt.s32.totalorder %s602_s24, %s392_s18 }
  0x3f   : > { %p389_p13 = pnand %p387_p12, %p373_p3  ;;  %p395_p10 = scmp.lt.s32.totalorder %s393_s21, %s386_s6 }
  0x41   : > { %p390_p0 = pneg %p389_p13  ;;  %p396_p1 = por %p395_p10, %p394_p5 }
  0x43   : > { %p397_p2 = pnand %p396_p1, %p390_p0 }
  0x45   : > { %400 = shalt.err (!%p397_p2)
}
  0x46   : > { %301 = dma.hbm_to_vmem [thread:$0]  (!%p598_p11), %s596_s19, 128, %s602_s24, %s122_s27  }
  0x47   : > { %p709_p7 = scmp.ne.s32.totalorder %s700_s17, 0 }
  0x48   : > { %p710_p3 = scmp.eq.s32.totalorder (!%p709_p7), %s512_s13, 0 }
  0x49   : > { %141 = sbr.rel (%p709_p7) target bundleno = 110 (0x6e), region = 28 }
  0x50   : > { %446 = dma.done.wait (%p710_p3), [#allocation3], 128   ;;  %p711_p4 = pmov %p710_p3 }
  0x51   : > { %s636_s22 = sand.u32 1, %s463_s10   ;;  %p712_p6 = scmp.ne.s32.totalorder %s698_s15, 0 }
  0x52   : > { %448 = vsyncadd (%p711_p4), [#allocation3], 4294967168  ;;  %s280_s25 = sshll.u32 %s636_s22, 3  ;;  %s148_s23 = scalar_lea.sflag [#allocation6], %s636_s22 }
  0x53   : > { %s151_s26 = scalar_lea.vmem [#allocation5], %s280_s25 }
  0x54   : > { %450 = dma.done.wait (%p712_p6), %s148_s23, 128  }
  0x55   : > { %452 = vsyncadd (%p712_p6), %s148_s23, 4294967168  ;;  %s171_s17 = scalar_lea.vmem [#allocation7], %s280_s25  ;;  %s283_s24 = sshll.u32 %s512_s13, 7  ;;  %v172_v0 = vld [vmem:[%s151_s26] sm:$0xff]  ;;  %v173_v1 = vld [vmem:[#allocation2] sm:$0xff] }
  0x56   : > { %s190_s19 = sshll.u32 %s171_s17, 4  ;;  %v174_v2 = vadd.f32 %v173_v1, %v172_v0  ;;  %s650_s29 = scalar_lea.hbm %s694_s2, %s283_s24  ;;  %s645_s19 = int_to_ptr.vmem [resolvable:$true] %s190_s19 }
  0x57   : > { %s177_s15 = scalar_lea.sflag [#allocation4], %s636_s22  ;;  %s401_s30 = scalar_lea.vmem %s645_s19, 128 }
  0x58   : > { %175 = vst [vmem:[%s171_s17] sm:$0xff] %v174_v2  ;;  %p402_p11 = scmp.ne.s32.totalorder %s645_s19, %s401_s30  ;;  %s475_s13 = smov [#allocation7]  }
  0x59   : > { %s405_s3 = sshll.u32 %s475_s13, 4  ;;  %s406_s3 = int_to_ptr.vmem [resolvable:$false] %s405_s3 }
  0x5a   : > { %p403_p9 = pnand %p402_p11, %p583_p8  ;;  %s407_s4 = scalar_lea.vmem %s406_s3, 256 }
  0x5b   : > { %p408_p13 = scmp.lt.s32.totalorder %s645_s19, %s406_s3  ;;  %p409_p0 = scmp.lt.s32.totalorder %s407_s4, %s401_s30 }
  0x5c   : > { %p404_p12 = pneg %p403_p9 }
  0x5d   : > { %p410_p5 = por %p409_p0, %p408_p13 }
  0x5f   : > { %p411_p10 = pnand %p410_p5, %p404_p12 }
  0x61   : > { %414 = shalt.err (!%p411_p10)
}
  0x62   : > { %s415_s5 = scalar_lea.hbm %s650_s29, 128  ;;  %s419_s18 = scalar_lea.hbm %s694_s2, 256 }
  0x63   : > { %p416_p1 = scmp.ne.s32.totalorder %s650_s29, %s415_s5  ;;  %p420_p3 = scmp.lt.u32.totalorder %s650_s29, %s694_s2 }
  0x64   : > { %p421_p4 = scmp.lt.u32.totalorder %s419_s18, %s415_s5  ;;  %p423_p11 = scmp.lt.u32.totalorder %s415_s5, %s650_s29 }
  0x65   : > { %p417_p2 = pnand %p416_p1, %p583_p8 }
  0x66   : > { %p422_p6 = por %p421_p4, %p420_p3 }
  0x67   : > { %p418_p7 = pneg %p417_p2 }
  0x68   : > { %p424_p9 = por %p423_p11, %p422_p6 }
  0x6a   : > { %p425_p12 = pnand %p424_p9, %p418_p7 }
  0x6c   : > { %428 = shalt.err (!%p425_p12)
}
  0x6d   : > { %292 = dma.vmem_to_hbm [thread:$0]  (%p583_p8), %s645_s19, 128, %s650_s29, %s177_s15  }
  0x6e PF: > { %s202_s25 = sand.u32 1, %s459_s9   ;;  %p713_p13 = scmp.ne.s32.totalorder %s699_s16, 0 }
  0x6f   : > { %p714_p0 = scmp.ge.s32.totalorder %s471_s12, 2  ;;  %s203_s23 = scalar_lea.sflag [#allocation4], %s202_s25 }
  0x71   : > { %p303_p5 = pnand %p714_p0, %p713_p13 }
  0x73   : > { %454 = dma.done.wait (!%p303_p5), %s203_s23, 128  }
  0x74   : > { %456 = vsyncadd (!%p303_p5), %s203_s23, 4294967168  ;;  %p16_p10 = scmp.ge.s32.totalorder %s539_s20, 4   ;;  %s715_s9 = smov %s463_s10 }
  0x75   : > { %s716_s10 = smov %s467_s11  ;;  %s717_s11 = smov %s575_s7 }
  0x76   : > { %s718_s12 = smov %s539_s20  ;;  %18 = sbr.rel (!%p16_p10) target bundleno = 6 (0x6), region = 78 }
  0x7d   :  { %208 = vsyncpa [#allocation3], 1 }
  0x7e   :  { %210 = vsyncpa [#allocation3 + $0x1], 1 }
  0x7f   :  { %211 = vsyncpa [#allocation6], 1 }
  0x80   :  { %213 = vsyncpa [#allocation6 + $0x1], 1 }
  0x81   :  { %214 = vsyncpa [#allocation4], 1 }
  0x82   :  { %216 = vsyncpa [#allocation4 + $0x1], 1 }

// kernel: tpu_custom_call.1
= control target key start
LH: loop header
LB: loop body
LE: loop exit
PB: predicated region body
PF: predicated region fallthrough
CT: control target
= control target key end

     0   :  { %s2463_s0 = inlined_call_operand.hbm [shape: f32[8,16,32], index: 0, kind: input, shape index: {}]   ;;  %s2464_s1 = inlined_call_operand.hbm [shape: bf16[8,16,32], index: 1, kind: input, shape index: {}]   ;;  %s2465_s2 = inlined_call_operand.hbm [shape: f32[2,16,16], index: 2, kind: input, shape index: {}]   ;;  %s2466_s3 = inlined_call_operand.vmem [shape: f32[1,32], index: 3, kind: input, shape index: {}]   ;;  %s2467_s4 = inlined_call_operand.vmem [shape: f32[1,32], index: 4, kind: input, shape index: {}]   ;;  %s2468_s5 = inlined_call_operand.vmem [shape: bf16[32,64], index: 5, kind: input, shape index: {}]   ;;  %s2469_s6 = inlined_call_operand.vmem [shape: f32[1,64], index: 6, kind: input, shape index: {}]   ;;  %s2470_s7 = inlined_call_operand.hbm [shape: bf16[32,32], index: 7, kind: input, shape index: {}]   ;;  %s2471_s8 = inlined_call_operand.vmem [shape: f32[1,32], index: 8, kind: input, shape index: {}]   ;;  %s2472_s9 = inlined_call_operand.hbm [shape: f32[8,16,32], index: 9, kind: output, shape index: {}]  }
   0x1   :  { %2487 = sst [smem:[#allocation25_spill]] %s2463_s0 }
   0x2   :  { %2488 = sst [smem:[#allocation26_spill]] %s2465_s2 }
   0x3   :  { %2489 = sst [smem:[#allocation27_spill]] %s2470_s7 }
   0x4   :  { %2490 = sst [smem:[#allocation28_spill]] %s2471_s8 }
   0x5   :  { %2491 = sst [smem:[#allocation29_spill]] %s2472_s9 }
   0x6   :  { %14 = vsyncpa [#allocation4], 0 }
   0x7   :  { %16 = vsyncpa [#allocation4 + $0x1], 0 }
   0x8   :  { %17 = vsyncpa [#allocation7], 0 }
   0x9   :  { %19 = vsyncpa [#allocation7 + $0x1], 0 }
   0xa   :  { %20 = vsyncpa [#allocation10], 0 }
   0xb   :  { %21 = vsyncpa [#allocation5], 0 }
   0xc   :  { %23 = vsyncpa [#allocation5 + $0x1], 0  ;;  %s1986_s30 = smov 0   ;;  %s1988_s10 = smov 0  }
   0xd   :  { %s1990_s11 = smov 0   ;;  %s1992_s12 = smov 0  }
   0xe   :  { %s1994_s13 = smov 0   ;;  %s1996_s14 = smov 0  }
   0xf   :  { %s1998_s15 = smov 0   ;;  %s2000_s16 = smov 0  }
  0x10 LB: > { %2492 = sst [smem:[#allocation17_spill]] %s1889_s30  ;;  %s2027_s17 = sadd.s32 4294967295, %s1917_s16   ;;  %s1917_s16 = sphi %s2000_s16, %s29_s16   ;;  %s1913_s15 = sphi %s1998_s15, %s2531_s15   ;;  %s1909_s14 = sphi %s1996_s14, %s2530_s14   ;;  %s1905_s13 = sphi %s1994_s13, %s2529_s13   ;;  %s1901_s12 = sphi %s1992_s12, %s2528_s12   ;;  %s1897_s11 = sphi %s1990_s11, %s2534_s11   ;;  %s1893_s10 = sphi %s1988_s10, %s2533_s10   ;;  %s1889_s30 = sphi %s1986_s30, %s2532_s30  }
  0x11   : > { %2493 = sst [smem:[#allocation18_spill]] %s1901_s12  ;;  %s1379_s18 = sadd.s32 4294967294, %s1917_s16  }
  0x12   : > { %2494 = sst [smem:[#allocation19_spill]] %s1909_s14  ;;  %p65_p0 = scmp.ne.s32.totalorder %s1893_s10, %s1889_s30 }
  0x13   : > { %2495 = sst [smem:[#allocation20_spill]] %s1913_s15  ;;  %p2475_p1 = scmp.eq.s32.totalorder %s2027_s17, 0 }
  0x14   : > { %p276_p3 = scmp.eq.s32.totalorder %s1379_s18, 3  ;;  %p1386_p5 = scmp.ge.s32.totalorder %s1917_s16, 1 }
  0x15   : > { %p2036_p4 = por %p2475_p1, %p65_p0  ;;  %p283_p7 = scmp.lt.s32.totalorder %s1917_s16, 5 }
  0x16   : > { %p2041_p6 = por %p276_p3, %p65_p0  ;;  %s1919_s22 = smov [#allocation8]  }
  0x17   : > { %s2496_s19 = scalar_select %p2036_p4, 1, 0 }
  0x18   : > { %s2497_s20 = scalar_select %p2041_p6, 1, 0 }
  0x19   : > { %p2046_p8 = pnand %p1386_p5, %p283_p7  ;;  %s295_s23 = sshll.u32 %s1919_s22, 4  ;;  %s296_s23 = int_to_ptr.vmem [resolvable:$true] %s295_s23 }
  0x1a   : > { %2498 = sst [smem:[#allocation21_spill]] %s2497_s20  ;;  %s1920_s25 = smov [#allocation9]  }
  0x1b   : > { %s2499_s21 = scalar_select %p2046_p8, 1, 0 }
  0x1c   : > { %p1543_p9 = pneg %p2046_p8  ;;  %s320_s26 = sshll.u32 %s1920_s25, 4  ;;  %s2058_s26 = int_to_ptr.vmem [resolvable:$true] %s320_s26 }
  0x1d   : > { %s2501_s2 = sld [smem:[#allocation26_spill]] }
  0x1e   : > { %p2054_p10 = pnand %p1543_p9, %p2475_p1 }
  0x20   : > { %p1693_p12 = pneg %p2054_p10 }
  0x23   : > { %s1691_s29 = scalar_lea.hbm %s2501_s2, 512 }
  0x24   : > { %p1692_p11 = scmp.ne.s32.totalorder %s2501_s2, %s1691_s29  ;;  %p1698_p3 = scmp.lt.u32.totalorder %s1691_s29, %s2501_s2 }
  0x26   : > { %p1694_p13 = pnand %p1693_p12, %p1692_p11 }
  0x28   : > { %p1695_p0 = pneg %p1694_p13 }
  0x2a   : > { %p1700_p5 = pnand %p1698_p3, %p1695_p0 }
  0x2c   : > { %1703 = shalt.err (!%p1700_p5)
}
  0x2d   : > { %s1704_s25 = scalar_lea.vmem %s296_s23, 512  ;;  %p1712_p2 = scmp.lt.s32.totalorder %s296_s23, %s296_s23 }
  0x2e   : > { %p1705_p7 = scmp.ne.s32.totalorder %s296_s23, %s1704_s25  ;;  %p1713_p6 = scmp.lt.s32.totalorder %s1704_s25, %s1704_s25 }
  0x30   : > { %p1707_p9 = pnand %p1705_p7, %p1693_p12  ;;  %p1714_p4 = por %p1713_p6, %p1712_p2 }
  0x32   : > { %p1708_p1 = pneg %p1707_p9 }
  0x34   : > { %p1715_p8 = pnand %p1714_p4, %p1708_p1 }
  0x36   : > { %1718 = shalt.err (!%p1715_p8)
}
  0x37   : > { %s2481_s27 = smov 128   ;;  %s2482_s28 = smov 8  }
  0x38   : > { %1546 = dma.hbm_to_vmem [thread:$0]  (!%p2054_p10), %s2501_s2, 512, %s296_s23, [#allocation7], %s2481_s27, %s2481_s27, %s2482_s28  }
  0x39   : > { %s2502_s7 = sld [smem:[#allocation27_spill]] }
  0x3f   : > { %s1719_s22 = scalar_lea.hbm %s2502_s7, 256 }
  0x40   : > { %p1720_p1 = scmp.ne.s32.totalorder %s2502_s7, %s1719_s22  ;;  %p1726_p6 = scmp.lt.u32.totalorder %s1719_s22, %s2502_s7 }
  0x42   : > { %p1722_p2 = pnand %p1720_p1, %p1693_p12 }
  0x44   : > { %p1723_p4 = pneg %p1722_p2 }
  0x46   : > { %p1728_p8 = pnand %p1726_p6, %p1723_p4 }
  0x48   : > { %1731 = shalt.err (!%p1728_p8)
}
  0x49   : > { %s1732_s23 = scalar_lea.vmem %s2058_s26, 256  ;;  %p1740_p3 = scmp.lt.s32.totalorder %s2058_s26, %s2058_s26 }
  0x4a   : > { %p1733_p11 = scmp.ne.s32.totalorder %s2058_s26, %s1732_s23  ;;  %p1741_p5 = scmp.lt.s32.totalorder %s1732_s23, %s1732_s23 }
  0x4c   : > { %p1735_p13 = pnand %p1733_p11, %p1693_p12  ;;  %p1742_p7 = por %p1741_p5, %p1740_p3 }
  0x4e   : > { %p1736_p0 = pneg %p1735_p13 }
  0x50   : > { %p1743_p9 = pnand %p1742_p7, %p1736_p0 }
  0x52   : > { %1746 = shalt.err (!%p1743_p9)
}
  0x53   : > { %s2479_s8 = smov 64   ;;  %s2480_s9 = smov 4  }
  0x54   : > { %1549 = dma.hbm_to_vmem [thread:$0]  (!%p2054_p10), %s2502_s7, 256, %s2058_s26, [#allocation10], %s2479_s8, %s2479_s8, %s2480_s9  }
  0x55   : > { %s38_s20 = sadd.s32 1, %s1909_s14  ;;  %s41_s29 = sadd.s32 1, %s1913_s15 }
  0x56   : > { %p39_p12 = scmp.ge.s32.totalorder %s38_s20, 2  ;;  %s1380_s18 = sshll.u32 %s1913_s15, 1 }
  0x57   : > { %s2117_s22 = sadd.s32 %s1909_s14, %s1380_s18  ;;  %s52_s25 = sadd.s32 1, %s1897_s11 }
  0x58   : > { %s2536_s20 = smov (%p39_p12, %s38_s20), 0  ;;  %s2538_s29 = smov (!%p39_p12, %s41_s29), %s1913_s15 }
  0x59   : > { %2503 = sst [smem:[#allocation22_spill]] %s2536_s20  ;;  %p59_p1 = scmp.ne.s32.totalorder %s1897_s11, %s1893_s10 }
  0x5a   : > { %p60_p2 = scmp.eq.s32.totalorder %s1917_s16, 0  ;;  %p43_p4 = scmp.ge.s32.totalorder %s2538_s29, 2 }
  0x5b   : > { %p1563_p10 = scmp.lt.s32.totalorder %s1917_s16, 4  ;;  %p2505_p8 = scmp.eq.s32.totalorder %s2027_s17, 3 }
  0x5c   : > { %p2127_p6 = por %p60_p2, %p59_p1  ;;  %s2540_s29 = smov (%p43_p4, %s2538_s29), 0 }
  0x5d   : > { %p2133_p11 = por %p2505_p8, %p59_p1  ;;  %2507 = sst [smem:[#allocation23_spill]] %s2540_s29 }
  0x5e   : > { %s2140_s23 = sand.u32 1, %s1897_s11   ;;  %s1436_s12 = sshll.u32 %s2117_s22, 9 }
  0x5f   : > { %s1381_s30 = sshll.u32 %s2540_s29, 1  ;;  %s1390_s8 = sshll.u32 %s2140_s23, 5 }
  0x60   : > { %s48_s18 = sadd.s32 %s1381_s30, %s2536_s20  ;;  %s2508_s0 = sld [smem:[#allocation25_spill]] }
  0x61   : > { %s49_s9 = ssub.s32 %s2117_s22, %s48_s18  ;;  %s341_s7 = scalar_lea.vmem [#allocation3], %s1390_s8 }
  0x62   : > { %p50_p13 = scmp.eq.s32.totalorder %s49_s9, 0  ;;  %s351_s15 = sshll.u32 %s341_s7, 4  ;;  %s2163_s15 = int_to_ptr.vmem [resolvable:$true] %s351_s15 }
  0x63   : > { %p2156_p0 = pnand %p1563_p10, %p2127_p6  ;;  %s338_s27 = scalar_lea.sflag [#allocation4], %s2140_s23 }
  0x64   : > { %s2161_s9 = scalar_select %p50_p13, %s1897_s11, %s52_s25  }
  0x65   : > { %p1749_p5 = pneg %p2156_p0 }
  0x66   : > { %s2150_s2 = scalar_lea.hbm %s2508_s0, %s1436_s12  ;;  %2510 = sst [smem:[#allocation24_spill]] %s2161_s9 }
  0x67   : > { %s1747_s28 = scalar_lea.hbm %s2150_s2, 512  ;;  %s1752_s24 = scalar_lea.hbm %s2508_s0, 2048 }
  0x68   : > { %p1748_p3 = scmp.ne.s32.totalorder %s2150_s2, %s1747_s28  ;;  %p1753_p12 = scmp.lt.u32.totalorder %s2150_s2, %s2508_s0 }
  0x69   : > { %p1754_p1 = scmp.lt.u32.totalorder %s1752_s24, %s1747_s28  ;;  %p1756_p4 = scmp.lt.u32.totalorder %s1747_s28, %s2150_s2 }
  0x6a   : > { %p1750_p7 = pnand %p1749_p5, %p1748_p3 }
  0x6b   : > { %p1755_p2 = por %p1754_p1, %p1753_p12 }
  0x6c   : > { %p1751_p9 = pneg %p1750_p7 }
  0x6d   : > { %p1757_p10 = por %p1756_p4, %p1755_p2 }
  0x6f   : > { %p1758_p6 = pnand %p1757_p10, %p1751_p9 }
  0x71   : > { %1761 = shalt.err (!%p1758_p6)
}
  0x72   : > { %s1762_s25 = scalar_lea.vmem %s2163_s15, 512  ;;  %s1925_s18 = smov [#allocation3]  }
  0x73   : > { %p1763_p8 = scmp.ne.s32.totalorder %s2163_s15, %s1762_s25  ;;  %s1767_s7 = sshll.u32 %s1925_s18, 4  ;;  %s1768_s7 = int_to_ptr.vmem [resolvable:$false] %s1767_s7 }
  0x74   : > { %s1769_s8 = scalar_lea.vmem %s1768_s7, 1024  ;;  %p1770_p7 = scmp.lt.s32.totalorder %s2163_s15, %s1768_s7 }
  0x75   : > { %p1765_p13 = pnand %p1763_p8, %p1749_p5  ;;  %p1771_p12 = scmp.lt.s32.totalorder %s1769_s8, %s1762_s25 }
  0x77   : > { %p1766_p3 = pneg %p1765_p13  ;;  %p1772_p1 = por %p1771_p12, %p1770_p7 }
  0x79   : > { %p1773_p2 = pnand %p1772_p1, %p1766_p3 }
  0x7b   : > { %1776 = shalt.err (!%p1773_p2)
}
  0x7c   : > { %s2511_s28 = smov 8   ;;  %s2512_s24 = smov 128  }
  0x7d   : > { %1553 = dma.hbm_to_vmem [thread:$0]  (!%p2156_p0), %s2150_s2, 512, %s2163_s15, %s338_s27, %s2512_s24, %s2512_s24, %s2511_s28  }
  0x7e   : > { %s361_s12 = sand.u32 1, %s1917_s16   ;;  %s1395_s30 = sshll.u32 %s2140_s23, 4 }
  0x7f   : > { %s1438_s25 = sshll.u32 %s2117_s22, 8  ;;  %s365_s18 = scalar_lea.vmem [#allocation6], %s1395_s30 }
  0x80   : > { %s375_s7 = sshll.u32 %s365_s18, 4  ;;  %s2202_s29 = scalar_lea.hbm %s2464_s1, %s1438_s25  ;;  %s2204_s7 = int_to_ptr.vmem [resolvable:$true] %s375_s7 }
  0x81   : > { %s2206_s20 = scalar_lea.sflag [#allocation7], %s361_s12  ;;  %s1777_s9 = scalar_lea.hbm %s2202_s29, 256 }
  0x82   : > { %p1778_p9 = scmp.ne.s32.totalorder %s2202_s29, %s1777_s9  ;;  %s1782_s0 = scalar_lea.hbm %s2464_s1, 1024 }
  0x83   : > { %p1783_p6 = scmp.lt.u32.totalorder %s2202_s29, %s2464_s1  ;;  %p1784_p8 = scmp.lt.u32.totalorder %s1782_s0, %s1777_s9 }
  0x84   : > { %p1780_p4 = pnand %p1778_p9, %p1749_p5  ;;  %p1786_p3 = scmp.lt.u32.totalorder %s1777_s9, %s2202_s29 }
  0x85   : > { %p1785_p13 = por %p1784_p8, %p1783_p6 }
  0x86   : > { %p1781_p10 = pneg %p1780_p4 }
  0x87   : > { %p1787_p7 = por %p1786_p3, %p1785_p13 }
  0x89   : > { %p1788_p12 = pnand %p1787_p7, %p1781_p10 }
  0x8b   : > { %1791 = shalt.err (!%p1788_p12)
}
  0x8c   : > { %s1792_s27 = scalar_lea.vmem %s2204_s7, 256  ;;  %s1926_s28 = smov [#allocation6]  }
  0x8d   : > { %p1793_p1 = scmp.ne.s32.totalorder %s2204_s7, %s1792_s27  ;;  %s1797_s24 = sshll.u32 %s1926_s28, 4  ;;  %s1798_s24 = int_to_ptr.vmem [resolvable:$false] %s1797_s24 }
  0x8e   : > { %s1799_s12 = scalar_lea.vmem %s1798_s24, 512  ;;  %p1800_p4 = scmp.lt.s32.totalorder %s2204_s7, %s1798_s24 }
  0x8f   : > { %p1795_p2 = pnand %p1793_p1, %p1749_p5  ;;  %p1801_p6 = scmp.lt.s32.totalorder %s1799_s12, %s1792_s27 }
  0x91   : > { %p1796_p9 = pneg %p1795_p2  ;;  %p1802_p8 = por %p1801_p6, %p1800_p4 }
  0x93   : > { %p1803_p13 = pnand %p1802_p8, %p1796_p9 }
  0x95   : > { %1806 = shalt.err (!%p1803_p13)
}
  0x96   : > { %s2513_s9 = smov 4   ;;  %s2514_s30 = smov 64  }
  0x97   : > { %1556 = dma.hbm_to_vmem [thread:$0]  (!%p2156_p0), %s2202_s29, 256, %s2204_s7, %s2206_s20, %s2514_s30, %s2514_s30, %s2513_s9  }
  0x98   : > { %p2515_p5 = scmp.ne.s32.totalorder %s2499_s21, 0 }
  0x99   : > { %s2238_s25 = sand.u32 (!%p2515_p5), 1, %s1893_s10   ;;  %p2516_p10 = scmp.ne.s32.totalorder (!%p2515_p5), %s2496_s19, 0 }
  0x9a   : > { %387 = sbr.rel (%p2515_p5) target bundleno = 2504 (0x9c8), region = 56  ;;  %s1401_s18 = sshll.u32 (!%p2515_p5), %s2238_s25, 5 }
  0x9b   : > { %s390_s8 = scalar_lea.sflag (!%p2515_p5), [#allocation4], %s2238_s25  ;;  %s393_s14 = scalar_lea.vmem (!%p2515_p5), [#allocation3], %s1401_s18 }
  0xa1   : > { %1868 = dma.done.wait (%p2516_p10), %s390_s8, 512  }
  0xa2   : > { %1870 = vsyncadd (%p2516_p10), %s390_s8, 4294966784  ;;  %s398_s21 = sand.u32 1, %s2027_s17   ;;  %s1402_s20 = sshll.u32 %s2238_s25, 4 }
  0xa3   : > { %s399_s29 = scalar_lea.sflag [#allocation7], %s398_s21  ;;  %s2250_s7 = scalar_lea.vmem [#allocation6], %s1402_s20 }
  0xa4   : > { %1872 = dma.done.wait (%p2516_p10), %s399_s29, 256  }
  0xa5   : > { %1874 = vsyncadd (%p2516_p10), %s399_s29, 4294967040  ;;  %p2517_p0 = scmp.eq.s32.totalorder %s2027_s17, 0 }
  0xa7   : > { %1876 = dma.done.wait (%p2517_p0), [#allocation7], 512   ;;  %p2518_p3 = pmov %p2517_p0 }
  0xa8   : > { %p2519_p7 = pmov %p2517_p0 }
  0xa9   : > { %1878 = vsyncadd (%p2518_p3), [#allocation7], 4294966784 }
  0xaa   : > { %1880 = dma.done.wait (%p2519_p7), [#allocation10], 256   ;;  %p2520_p12 = pmov %p2517_p0 }
  0xab   : > { %vm464_vm0 = vcmask 261120   ;;  %v2264_v0 = vld [vmem:[%s393_s14] sm:$0xff]  ;;  %v2266_v1 = vld [vmem:[%s393_s14 + $0x10] sm:$0xff]  ;;  %v2268_v2 = vld [vmem:[%s393_s14 + $0x8] sm:$0xff]  ;;  %v1927_v62 = vmov 0.0   ;;  %vm1928_vm1 = vmmov 0  }
  0xac   : > { %1882 = vsyncadd (%p2520_p12), [#allocation10], 4294967040  ;;  %v465_v3 = vsel %vm464_vm0, %v2264_v0, 0.0  ;;  %v471_v4 = vsel %vm464_vm0, %v2266_v1, 0.0  ;;  %v2274_v5 = vld [vmem:[%s393_s14 + $0x18] sm:$0xff]  ;;  %v468_v6 = vsel %vm464_vm0, %v2268_v2, 0.0  ;;  %1473 = vmatprep.subr.bf16.mxu1 %v1927_v62  ;;  %1475 = vmatprep.mubr.msk.bf16.mxu1 %vm1928_vm1, %v1927_v62 }
  0xad   : > { %466 = vadd.xlane.f32.xlu0 %v465_v3  ;;  %472 = vadd.xlane.f32.xlu1 %v471_v4  ;;  %v474_v7 = vsel %vm464_vm0, %v2274_v5, 0.0  ;;  %v1645_v28 = vld [vmem:[%s2468_s5] sm:$0xff]   ;;  %v1646_v29 = vld [vmem:[%s2468_s5 + $0x8] sm:$0xff]   ;;  %s1929_s12 = smov 96   ;;  %vm631_vm2 = vcmask 130048   ;;  %s1930_s9 = smov 80  }
  0xae   : > { %1465 = vmatprep.subr.bf16.mxu0 %v1645_v28  ;;  %v1406_v44 = vld [vmem:[%s2466_s3] ss:$0 sm:$0xff]  ;;  %s1931_s30 = smov 112   ;;  %s2521_s8 = sld [smem:[#allocation18_spill]]  ;;  %vm1134_vm3 = vcmask 261248  }
  0xaf   : > { %1466 = vmatpush3.bf16.msra.mxu0 %v1645_v28  ;;  %v1407_v50 = vld [vmem:[%s2467_s4] ss:$0 sm:$0xff]  ;;  %s1932_s14 = smov 16   ;;  %s1429_s21 = sshll.u32 %s1905_s13, 1 }
  0xb0   : > { %1467 = vmatprep.subr.bf16.mxu0 %v1646_v29  ;;  %v1408_v3 = vld [vmem:[%s2469_s6] ss:$0 sm:$0xff]  ;;  %s2522_s17 = sld [smem:[#allocation28_spill]]  ;;  %s449_s19 = scalar_lea.vmem [#allocation11], %s1401_s18 }
  0xb1   : > { %469 = vadd.xlane.f32.xlu0 %v468_v6  ;;  %475 = vadd.xlane.f32.xlu1 %v474_v7  ;;  %s1246_s2 = sshll.u32 %s449_s19, 4  ;;  %s2523_s0 = sld [smem:[#allocation29_spill]]  ;;  %s2399_s2 = int_to_ptr.vmem [resolvable:$true] %s1246_s2 }
  0xb2   : > { %s1230_s23 = scalar_lea.sflag [#allocation5], %s2238_s25  ;;  %s1807_s27 = scalar_lea.vmem %s2399_s2, 512 }
  0xb3   : > { %1468 = vmatpush3.bf16.msra.mxu0 %v1646_v29  ;;  %p1808_p1 = scmp.ne.s32.totalorder %s2399_s2, %s1807_s27  ;;  %s1933_s28 = smov [#allocation11]  }
  0xb4   : > { %1479 = vmatprep.subr.bf16.mxu0 %v1927_v62  ;;  %s1238_s20 = sadd.s32 %s2521_s8, %s1429_s21  ;;  %s1811_s24 = sshll.u32 %s1933_s28, 4  ;;  %s1812_s24 = int_to_ptr.vmem [resolvable:$false] %s1811_s24 }
  0xb5   : > { %s1440_s15 = sshll.u32 %s1238_s20, 9  ;;  %p1809_p2 = pnand %p1808_p1, %p2133_p11 }
  0xb6   : > { %p1814_p4 = scmp.lt.s32.totalorder %s2399_s2, %s1812_s24 }
  0xb7   : > { %s2406_s22 = scalar_lea.hbm %s2523_s0, %s1440_s15  ;;  %p1810_p9 = pneg %p1809_p2 }
 0x13a   : > { %v467_v8 = vpop.xlane.xlu0 %466  ;;  %v473_v9 = vpop.xlane.xlu1 %472 }
 0x13b   : > { %v478_v10 = vmul.f32 0.03125, %v467_v8  ;;  %v480_v11 = vmul.f32 0.03125, %v473_v9 }
 0x13d   : > { %v482_v12 = vsub.f32 %v2264_v0, %v478_v10  ;;  %v484_v13 = vsub.f32 %v2266_v1, %v480_v11 }
 0x13e   : > { %v470_v14 = vpop.xlane.xlu0 %469  ;;  %v476_v15 = vpop.xlane.xlu1 %475 }
 0x13f   : > { %v479_v16 = vmul.f32 0.03125, %v470_v14  ;;  %v481_v17 = vmul.f32 0.03125, %v476_v15  ;;  %v486_v18 = vmul.f32 %v482_v12, %v482_v12  ;;  %v488_v19 = vmul.f32 %v484_v13, %v484_v13 }
 0x141   : > { %v483_v20 = vsub.f32 %v2268_v2, %v479_v16  ;;  %v485_v21 = vsub.f32 %v2274_v5, %v481_v17  ;;  %v490_v22 = vsel %vm464_vm0, %v486_v18, 0.0  ;;  %v496_v23 = vsel %vm464_vm0, %v488_v19, 0.0  ;;  %v626_v18 = vld [vmem:[#allocation8] sm:$0xff] }
 0x142   : > { %491 = vadd.xlane.f32.xlu0 %v490_v22  ;;  %v627_v22 = vld [vmem:[#allocation8 + $0x8] sm:$0xff] }
 0x143   : > { %v487_v24 = vmul.f32 %v483_v20, %v483_v20  ;;  %v489_v25 = vmul.f32 %v485_v21, %v485_v21 }
 0x145   : > { %v493_v26 = vsel %vm464_vm0, %v487_v24, 0.0  ;;  %v499_v27 = vsel %vm464_vm0, %v489_v25, 0.0 }
 0x146   : > { %497 = vadd.xlane.f32.xlu0 %v496_v23  ;;  %494 = vadd.xlane.f32.xlu1 %v493_v26 }
 0x14a   : > { %500 = vadd.xlane.f32.xlu1 %v499_v27 }
 0x1cf   : > { %v492_v30 = vpop.xlane.xlu0 %491 }
 0x1d0   : > { %v502_v31 = vmul.f32 0.03125, %v492_v30 }
 0x1d2   : > { %v506_v32 = vadd.f32 1e-05, %v502_v31 }
 0x1d3   : > { %v495_v33 = vpop.xlane.xlu1 %494  ;;  %v498_v34 = vpop.xlane.xlu0 %497 }
 0x1d4   : > { %1651 = vrsqrt.f32 %v506_v32  ;;  %v503_v35 = vmul.f32 0.03125, %v495_v33  ;;  %v504_v36 = vmul.f32 0.03125, %v498_v34 }
 0x1d6   : > { %v507_v37 = vadd.f32 1e-05, %v503_v35  ;;  %v508_v38 = vadd.f32 1e-05, %v504_v36 }
 0x1d7   : > { %v501_v39 = vpop.xlane.xlu1 %500 }
 0x1d8   : > { %1653 = vrsqrt.f32 %v507_v37  ;;  %v505_v40 = vmul.f32 0.03125, %v501_v39 }
 0x1d9   : > { %1655 = vrsqrt.f32 %v508_v38 }
 0x1da   : > { %v509_v41 = vadd.f32 1e-05, %v505_v40 }
 0x1dc   : > { %1657 = vrsqrt.f32 %v509_v41 }
 0x1de   : > { %v1652_v42 = vpop.eup %1651 }
 0x1df   : > { %v514_v43 = vmul.f32 %v1652_v42, %v482_v12 }
 0x1e1   : > { %v525_v48 = vmul.f32 %v1406_v44, %v514_v43 }
 0x1e2   : > { %v1654_v45 = vpop.eup %1653 }
 0x1e3   : > { %v1656_v46 = vpop.eup %1655  ;;  %v515_v47 = vmul.f32 %v1654_v45, %v483_v20  ;;  %v536_v54 = vadd.f32 %v1407_v50, %v525_v48 }
 0x1e4   : > { %v516_v49 = vmul.f32 %v1656_v46, %v484_v13 }
 0x1e5   : > { %v526_v51 = vmul.f32 %v1406_v44, %v515_v47 }
 0x1e6   : > { %v1658_v52 = vpop.eup %1657  ;;  %v527_v56 = vmul.f32 %v1406_v44, %v516_v49 }
 0x1e7   : > { %v517_v53 = vmul.f32 %v1658_v52, %v485_v21  ;;  %v537_v55 = vadd.f32 %v1407_v50, %v526_v51 }
 0x1e8   : > { %v538_v59 = vadd.f32 %v1407_v50, %v527_v56  ;;  %v2342_v56 = vld [vmem:[%s2250_s7 + $0x8] sm:$0xff]  }
 0x1e9   : > { %v540_v57 = vpack.c.bf16 %v537_v55, %v536_v54  ;;  %v528_v58 = vmul.f32 %v1406_v44, %v517_v53 }
 0x1eb   : > { %1469 = vmatprep.mubr.msk.bf16.mxu0 %vm464_vm0, %v540_v57  ;;  %v539_v60 = vadd.f32 %v1407_v50, %v528_v58  ;;  %v2349_v57 = vld [vmem:[%s2250_s7] sm:$0xff]  }
 0x1ed   : > { %v541_v61 = vpack.c.bf16 %v539_v60, %v538_v59 }
 0x1ef   : > { %1470 = vmatmul.mubr.msk.bf16.vlgmr.msra.gmra.mrb[0].mxu0 %vm464_vm0, %v541_v61 }
 0x1f0   : > { %1481 = vmatprep.mubr.msk.bf16.mxu0 %vm1928_vm1, %v1927_v62 }
 0x2c2   : > { %v1471_v63 = vpop.f32.mrb[0].mxu0 }
 0x2c3   : > { %v605_v4 = vpop.f32.mrb[1].mxu0  ;;  %v614_v7 = vadd.f32 %v1471_v63, %v1408_v3 }
 0x2c4   : > { %v1472_v6 = vpop.f32.mrb[2].mxu0  ;;  %v606_v10 = vadd.f32 %v1408_v3, %v605_v4 }
 0x2c5   : > { %v617_v8 = vadd.f32 %v1472_v6, %v1408_v3  ;;  %v608_v9 = vpop.f32.mrb[3].mxu0 }
 0x2c6   : > { %v609_v11 = vadd.f32 %v1408_v3, %v608_v9 }
 0x2c7   : > { %v2311_v12 = vpack.c.bf16 %v617_v8, %v614_v7 }
 0x2c8   : > { %v2313_v13 = vpack.c.bf16 %v609_v11, %v606_v10 }
 0x2c9   : > { %680 = vrot.lane.b32.xlu1 %v2311_v12, %s1929_s12 }
 0x2ca   : > { %629 = vrot.lane.b32.xlu0 %v2313_v13, %s1929_s12  ;;  %s1813_s12 = scalar_lea.vmem %s1812_s24, 1024 }
 0x2cb   : > { %p1815_p6 = scmp.lt.s32.totalorder %s1813_s12, %s1807_s27 }
 0x2cd   : > { %p1816_p8 = por %p1815_p6, %p1814_p4 }
 0x2cf   : > { %p1817_p13 = pnand %p1816_p8, %p1810_p9 }
 0x33b   : > { %v681_v14 = vpop.permute.xlu1 %680 }
 0x33c   : > { %v686_v15 = vsel %vm631_vm2, %v681_v14, 0  ;;  %v630_v16 = vpop.permute.xlu0 %629 }
 0x33d   : > { %1480 = vmatpush3.bf16.xpose.msra.mxu0 %v686_v15  ;;  %v636_v17 = vsel %vm631_vm2, %v630_v16, 0 }
 0x33e   : > { %1474 = vmatpush3.bf16.xpose.msra.mxu1 %v636_v17  ;;  %1491 = vmatprep.subr.bf16.mxu0 %v1927_v62 }
 0x33f   : > { %1485 = vmatprep.subr.bf16.mxu1 %v1927_v62 }
 0x344   : > { %1482 = vmatmul.mubr.msk.bf16.vlgmr.msra.gmra.mrb[4].mxu0 %vm631_vm2, %v2311_v12 }
 0x345   : > { %1476 = vmatmul.mubr.msk.bf16.vlgmr.msra.gmra.mrb[0].mxu1 %vm631_vm2, %v2313_v13  ;;  %1493 = vmatprep.mubr.msk.bf16.mxu0 %vm1928_vm1, %v1927_v62 }
 0x346   : > { %1487 = vmatprep.mubr.msk.bf16.mxu1 %vm1928_vm1, %v1927_v62  ;;  %1492 = vmatpush3.bf16.msra.mxu0 %v2342_v56 }
 0x347   : > { %1503 = vmatprep.subr.bf16.mxu0 %v1927_v62  ;;  %1486 = vmatpush3.bf16.msra.mxu1 %v2349_v57 }
 0x348   : > { %1497 = vmatprep.subr.bf16.mxu1 %v1927_v62 }
 0x417   : > { %v722_v19 = vpop.f32.mrb[4].mxu0 }
 0x418   : > { %v672_v20 = vpop.f32.mrb[0].mxu1  ;;  %v1483_v21 = vpop.f32.mrb[5].mxu0  ;;  %v723_v32 = vadd.f32 %v722_v19, %v626_v18 }
 0x419   : > { %v673_v23 = vadd.f32 %v672_v20, %v626_v18  ;;  %v1477_v24 = vpop.f32.mrb[1].mxu1  ;;  %v725_v25 = vpop.f32.mrb[6].mxu0 }
 0x41a   : > { %v675_v26 = vpop.f32.mrb[2].mxu1  ;;  %v1484_v27 = vpop.f32.mrb[7].mxu0  ;;  %v726_v28 = vadd.f32 %v725_v25, %v627_v22  ;;  %v735_v35 = vsel %vm631_vm2, %v723_v32, -inf }
 0x41b   : > { %v676_v29 = vadd.f32 %v675_v26, %v627_v22  ;;  %v1478_v30 = vpop.f32.mrb[3].mxu1  ;;  %v729_v31 = vsel %vm631_vm2, %v673_v23, -inf }
 0x41c   : > { %730 = vmax.xlane.f32.xlu1 %v729_v31  ;;  %v738_v34 = vsel %vm631_vm2, %v726_v28, -inf }
 0x41d   : > { %v732_v33 = vsel %vm631_vm2, %v676_v29, -inf }
 0x41e   : > { %733 = vmax.xlane.f32.xlu0 %v732_v33  ;;  %v880_v33 = vld [vmem:[#allocation8 + $0x10] sm:$0xff] }
 0x420   : > { %739 = vmax.xlane.f32.xlu1 %v738_v34 }
 0x422   : > { %736 = vmax.xlane.f32.xlu0 %v735_v35 }
 0x431   : > { %935 = vrot.lane.b32.xlu1 %v2311_v12, %s1930_s9 }
 0x4a9   : > { %v731_v36 = vpop.xlane.xlu1 %730 }
 0x4aa   : > { %v741_v40 = vsub.f32 %v673_v23, %v731_v36  ;;  %v881_v36 = vld [vmem:[#allocation8 + $0x18] sm:$0xff] }
 0x4ab   : > { %v734_v37 = vpop.xlane.xlu0 %733 }
 0x4ac   : > { %v742_v38 = vsub.f32 %v676_v29, %v734_v37  ;;  %v745_v46 = vmul.f32 1.442695, %v741_v40 }
 0x4ad   : > { %v740_v39 = vpop.xlane.xlu1 %739 }
 0x4ae   : > { %v744_v41 = vsub.f32 %v726_v28, %v740_v39  ;;  %v747_v42 = vmul.f32 1.442695, %v742_v38 }
 0x4af   : > { %v737_v43 = vpop.xlane.xlu0 %736 }
 0x4b0   : > { %v751_v44 = vmul.f32 1.442695, %v744_v41  ;;  %v743_v45 = vsub.f32 %v723_v32, %v737_v43 }
 0x4b1   : > { %v936_v58 = vpop.permute.xlu1 %935 }
 0x4b2   : > { %1659 = vpow2.f32 %v751_v44  ;;  %v749_v47 = vmul.f32 1.442695, %v743_v45  ;;  %v941_v11 = vsel %vm631_vm2, %v936_v58, 0 }
 0x4b3   : > { %1661 = vpow2.f32 %v747_v42 }
 0x4b4   : > { %1663 = vpow2.f32 %v749_v47 }
 0x4b5   : > { %1665 = vpow2.f32 %v745_v46 }
 0x4bc   : > { %v1660_v48 = vpop.eup %1659 }
 0x4bd   : > { %v1662_v49 = vpop.eup %1661  ;;  %v762_v50 = vsel %vm631_vm2, %v1660_v48, 0.0 }
 0x4be   : > { %v1664_v51 = vpop.eup %1663  ;;  %763 = vadd.xlane.f32.xlu1 %v762_v50  ;;  %v756_v54 = vsel %vm631_vm2, %v1662_v49, 0.0 }
 0x4bf   : > { %v759_v52 = vsel %vm631_vm2, %v1664_v51, 0.0  ;;  %v1666_v53 = vpop.eup %1665 }
 0x4c0   : > { %760 = vadd.xlane.f32.xlu0 %v759_v52  ;;  %v753_v55 = vsel %vm631_vm2, %v1666_v53, 0.0 }
 0x4c2   : > { %757 = vadd.xlane.f32.xlu1 %v756_v54 }
 0x4c4   : > { %754 = vadd.xlane.f32.xlu0 %v753_v55 }
 0x4d3   : > { %882 = vrot.lane.b32.xlu1 %v2313_v13, %s1931_s30 }
 0x4d7   : > { %933 = vrot.lane.b32.xlu1 %v2311_v12, %s1931_s30 }
 0x4da   : > { %884 = vrot.lane.b32.xlu0 %v2313_v13, %s1930_s9 }
 0x54b   : > { %v764_v59 = vpop.xlane.xlu1 %763 }
 0x54c   : > { %1667 = vrcp.f32 %v764_v59 }
 0x54d   : > { %v761_v60 = vpop.xlane.xlu0 %760 }
 0x54e   : > { %1669 = vrcp.f32 %v761_v60 }
 0x54f   : > { %v758_v61 = vpop.xlane.xlu1 %757 }
 0x550   : > { %1671 = vrcp.f32 %v758_v61 }
 0x551   : > { %v755_v63 = vpop.xlane.xlu0 %754 }
 0x552   : > { %1673 = vrcp.f32 %v755_v63 }
 0x553   : > { %v883_v14 = vpop.permute.xlu1 %882 }
 0x555   : > { %v885_v15 = vpop.permute.xlu0 %884 }
 0x556   : > { %v1668_v3 = vpop.eup %1667  ;;  %v890_v17 = vsel %vm631_vm2, %v885_v15, 0 }
 0x557   : > { %v772_v6 = vmul.f32 %v1668_v3, %v1660_v48  ;;  %v934_v18 = vpop.permute.xlu1 %933 }
 0x558   : > { %v1670_v4 = vpop.eup %1669 }
 0x559   : > { %v771_v7 = vmul.f32 %v1670_v4, %v1664_v51 }
 0x55a   : > { %v1672_v8 = vpop.eup %1671 }
 0x55b   : > { %v774_v9 = vpack.c.bf16 %v772_v6, %v771_v7  ;;  %v770_v12 = vmul.f32 %v1672_v8, %v1662_v49 }
 0x55c   : > { %v1674_v10 = vpop.eup %1673 }
 0x55d   : > { %v769_v13 = vmul.f32 %v1674_v10, %v1666_v53  ;;  %1494 = vmatmul.mubr.msk.bf16.vlgmr.msra.gmra.mrb[8].mxu0 %vm631_vm2, %v774_v9 }
 0x55e   : > { %1504 = vmatpush3.bf16.xpose.msra.mxu0 %v941_v11  ;;  %1505 = vmatprep.mubr.msk.bf16.mxu0 %vm1928_vm1, %v1927_v62 }
 0x55f   : > { %v773_v16 = vpack.c.bf16 %v770_v12, %v769_v13  ;;  %1515 = vmatprep.subr.bf16.mxu0 %v1927_v62 }
 0x561   : > { %1488 = vmatmul.mubr.msk.bf16.vlgmr.msra.gmra.mrb[4].mxu1 %vm631_vm2, %v773_v16 }
 0x562   : > { %1498 = vmatpush3.bf16.xpose.msra.mxu1 %v890_v17  ;;  %1499 = vmatprep.mubr.msk.bf16.mxu1 %vm1928_vm1, %v1927_v62 }
 0x563   : > { %1509 = vmatprep.subr.bf16.mxu1 %v1927_v62 }
 0x565   : > { %1506 = vmatmul.mubr.msk.bf16.vlgmr.msra.gmra.mrb[12].mxu0 %vm631_vm2, %v934_v18 }
 0x566   : > { %1517 = vmatprep.mubr.msk.bf16.mxu0 %vm1928_vm1, %v1927_v62 }
 0x569   : > { %1500 = vmatmul.mubr.msk.bf16.vlgmr.msra.gmra.mrb[8].mxu1 %vm631_vm2, %v883_v14 }
 0x56a   : > { %1511 = vmatprep.mubr.msk.bf16.mxu1 %vm1928_vm1, %v1927_v62 }
 0x630   : > { %v868_v19 = vpop.f32.mrb[8].mxu0 }
 0x631   : > { %v1495_v20 = vpop.f32.mrb[9].mxu0 }
 0x632   : > { %v871_v21 = vpop.f32.mrb[10].mxu0 }
 0x633   : > { %v876_v22 = vpack.c.bf16 %v871_v21, %v868_v19  ;;  %v1496_v23 = vpop.f32.mrb[11].mxu0 }
 0x634   : > { %v818_v24 = vpop.f32.mrb[4].mxu1  ;;  %v1649_v23 = vld [vmem:[#allocation9] sm:$0xff]  }
 0x635   : > { %878 = vst.msk [vmem:[#allocation2 + $0x8] sm:$0xff] %vm631_vm2, %v876_v22  ;;  %v1489_v25 = vpop.f32.mrb[5].mxu1 }
 0x636   : > { %v821_v26 = vpop.f32.mrb[6].mxu1 }
 0x637   : > { %v875_v27 = vpack.c.bf16 %v821_v26, %v818_v24  ;;  %v1490_v28 = vpop.f32.mrb[7].mxu1  ;;  %v1650_v24 = vld [vmem:[#allocation9 + $0x8] sm:$0xff]  }
 0x638   : > { %v977_v29 = vpop.f32.mrb[12].mxu0 }
 0x639   : > { %877 = vst.msk [vmem:[#allocation2] sm:$0xff] %vm631_vm2, %v875_v27  ;;  %v1507_v30 = vpop.f32.mrb[13].mxu0  ;;  %v978_v38 = vadd.f32 %v977_v29, %v880_v33 }
 0x63a   : > { %v980_v31 = vpop.f32.mrb[14].mxu0 }
 0x63b   : > { %v1508_v32 = vpop.f32.mrb[15].mxu0  ;;  %v981_v43 = vadd.f32 %v980_v31, %v881_v36  ;;  %v990_v44 = vsel %vm631_vm2, %v978_v38, -inf }
 0x63c   : > { %v926_v62 = vpop.f32.mrb[8].mxu1 }
 0x63d   : > { %v927_v34 = vadd.f32 %v926_v62, %v880_v33  ;;  %v1501_v35 = vpop.f32.mrb[9].mxu1  ;;  %v993_v45 = vsel %vm631_vm2, %v981_v43, -inf }
 0x63e   : > { %v929_v37 = vpop.f32.mrb[10].mxu1 }
 0x63f   : > { %v930_v39 = vadd.f32 %v929_v37, %v881_v36  ;;  %v1502_v40 = vpop.f32.mrb[11].mxu1  ;;  %v984_v41 = vsel %vm631_vm2, %v927_v34, -inf }
 0x640   : > { %985 = vmax.xlane.f32.xlu0 %v984_v41 }
 0x641   : > { %v987_v42 = vsel %vm631_vm2, %v930_v39, -inf }
 0x642   : > { %988 = vmax.xlane.f32.xlu1 %v987_v42 }
 0x644   : > { %991 = vmax.xlane.f32.xlu0 %v990_v44 }
 0x648   : > { %994 = vmax.xlane.f32.xlu0 %v993_v45 }
 0x6cd   : > { %v986_v46 = vpop.xlane.xlu0 %985 }
 0x6ce   : > { %v996_v47 = vsub.f32 %v927_v34, %v986_v46 }
 0x6cf   : > { %v989_v48 = vpop.xlane.xlu1 %988 }
 0x6d0   : > { %v1000_v51 = vmul.f32 1.442695, %v996_v47  ;;  %v997_v52 = vsub.f32 %v930_v39, %v989_v48  ;;  %v1427_v39 = vld [vmem:[%s2522_s17] ss:$0 sm:$0xff] }
 0x6d1   : > { %v992_v49 = vpop.xlane.xlu0 %991 }
 0x6d2   : > { %v998_v50 = vsub.f32 %v978_v38, %v992_v49  ;;  %v1002_v58 = vmul.f32 1.442695, %v997_v52 }
 0x6d4   : > { %v1004_v53 = vmul.f32 1.442695, %v998_v50 }
 0x6d5   : > { %v995_v54 = vpop.xlane.xlu0 %994 }
 0x6d6   : > { %1675 = vpow2.f32 %v1004_v53  ;;  %v999_v55 = vsub.f32 %v981_v43, %v995_v54 }
 0x6d7   : > { %1677 = vpow2.f32 %v1000_v51 }
 0x6d8   : > { %v1006_v59 = vmul.f32 1.442695, %v999_v55 }
 0x6da   : > { %1679 = vpow2.f32 %v1006_v59 }
 0x6db   : > { %1681 = vpow2.f32 %v1002_v58 }
 0x6e0   : > { %v1676_v60 = vpop.eup %1675 }
 0x6e1   : > { %v1014_v61 = vsel %vm631_vm2, %v1676_v60, 0.0  ;;  %v1678_v63 = vpop.eup %1677 }
 0x6e2   : > { %1015 = vadd.xlane.f32.xlu0 %v1014_v61  ;;  %v1008_v4 = vsel %vm631_vm2, %v1678_v63, 0.0 }
 0x6e4   : > { %v1680_v3 = vpop.eup %1679 }
 0x6e5   : > { %v1017_v6 = vsel %vm631_vm2, %v1680_v3, 0.0  ;;  %v1682_v7 = vpop.eup %1681 }
 0x6e6   : > { %1009 = vadd.xlane.f32.xlu0 %v1008_v4  ;;  %1018 = vadd.xlane.f32.xlu1 %v1017_v6  ;;  %v1011_v8 = vsel %vm631_vm2, %v1682_v7, 0.0 }
 0x6ea   : > { %1012 = vadd.xlane.f32.xlu1 %v1011_v8 }
 0x6fb   : > { %1077 = vrot.lane.b32.xlu1 %v2342_v56, %s1931_s30 }
 0x6fc   : > { %1030 = vrot.lane.b32.xlu0 %v2349_v57, %s1931_s30 }
 0x76f   : > { %v1016_v9 = vpop.xlane.xlu0 %1015 }
 0x770   : > { %1683 = vrcp.f32 %v1016_v9 }
 0x773   : > { %v1010_v10 = vpop.xlane.xlu0 %1009  ;;  %v1019_v11 = vpop.xlane.xlu1 %1018 }
 0x774   : > { %1685 = vrcp.f32 %v1019_v11 }
 0x775   : > { %1687 = vrcp.f32 %v1010_v10 }
 0x777   : > { %v1013_v12 = vpop.xlane.xlu1 %1012  ;;  %v1031_v13 = vpop.permute.xlu0 %1030 }
 0x778   : > { %1689 = vrcp.f32 %v1013_v12  ;;  %1510 = vmatpush3.bf16.msra.mxu1 %v1031_v13 }
 0x779   : > { %1521 = vmatprep.subr.bf16.mxu1 %v1649_v23 }
 0x77a   : > { %v1684_v15 = vpop.eup %1683 }
 0x77b   : > { %v1078_v14 = vpop.permute.xlu1 %1077  ;;  %v1026_v18 = vmul.f32 %v1684_v15, %v1676_v60 }
 0x77c   : > { %1516 = vmatpush3.bf16.msra.mxu0 %v1078_v14 }
 0x77e   : > { %v1686_v16 = vpop.eup %1685 }
 0x77f   : > { %v1688_v17 = vpop.eup %1687  ;;  %v1027_v56 = vmul.f32 %v1686_v16, %v1680_v3 }
 0x780   : > { %v1024_v57 = vmul.f32 %v1688_v17, %v1678_v63 }
 0x781   : > { %v1029_v20 = vpack.c.bf16 %v1027_v56, %v1026_v18 }
 0x782   : > { %v1690_v19 = vpop.eup %1689 }
 0x783   : > { %v1025_v21 = vmul.f32 %v1690_v19, %v1682_v7  ;;  %1518 = vmatmul.mubr.msk.bf16.vlgmr.msra.gmra.mrb[16].mxu0 %vm631_vm2, %v1029_v20 }
 0x785   : > { %v1028_v22 = vpack.c.bf16 %v1025_v21, %v1024_v57 }
 0x787   : > { %1512 = vmatmul.mubr.msk.bf16.vlgmr.msra.gmra.mrb[12].mxu1 %vm631_vm2, %v1028_v22 }
 0x788   : > { %1522 = vmatpush3.bf16.msra.mxu1 %v1649_v23 }
 0x789   : > { %1523 = vmatprep.subr.bf16.mxu1 %v1650_v24 }
 0x78c   : > { %1524 = vmatpush3.bf16.msra.mxu1 %v1650_v24 }
 0x856   : > { %v1117_v25 = vpop.f32.mrb[16].mxu0 }
 0x857   : > { %v1519_v26 = vpop.f32.mrb[17].mxu0 }
 0x858   : > { %v1120_v27 = vpop.f32.mrb[18].mxu0 }
 0x859   : > { %v1125_v28 = vpack.c.bf16 %v1120_v27, %v1117_v25  ;;  %v1520_v29 = vpop.f32.mrb[19].mxu0 }
 0x85a   : > { %v1070_v30 = vpop.f32.mrb[12].mxu1 }
 0x85b   : > { %v1513_v31 = vpop.f32.mrb[13].mxu1 }
 0x85c   : > { %v1073_v32 = vpop.f32.mrb[14].mxu1 }
 0x85d   : > { %v1124_v33 = vpack.c.bf16 %v1073_v32, %v1070_v30  ;;  %v1514_v62 = vpop.f32.mrb[15].mxu1 }
 0x85f   : > { %1128 = vrot.lane.b32.xlu1 %v1124_v33, %s1932_s14 }
 0x863   : > { %1130 = vrot.lane.b32.xlu1 %v1125_v28, %s1932_s14 }
 0x8d1   : > { %v1129_v34 = vpop.permute.xlu1 %1128 }
 0x8d2   : > { %1135 = vst.msk [vmem:[#allocation2] sm:$0xff] %vm1134_vm3, %v1129_v34 }
 0x8d5   : > { %v1131_v35 = vpop.permute.xlu1 %1130 }
 0x8d6   : > { %1136 = vst.msk [vmem:[#allocation2 + $0x8] sm:$0xff] %vm1134_vm3, %v1131_v35 }
 0x8d9   : > { %v1137_v36 = vld [vmem:[#allocation2] sm:$0xff] }
 0x8da   : > { %1525 = vmatprep.mubr.msk.bf16.mxu1 %vm464_vm0, %v1137_v36 }
 0x8dd   : > { %v1138_v37 = vld [vmem:[#allocation2 + $0x8] sm:$0xff] }
 0x8de   : > { %1526 = vmatmul.mubr.msk.bf16.vlgmr.msra.gmra.mrb[16].mxu1 %vm464_vm0, %v1138_v37 }
 0x9b1   : > { %v1527_v38 = vpop.f32.mrb[16].mxu1 }
 0x9b2   : > { %v1212_v40 = vadd.f32 %v1527_v38, %v2266_v1  ;;  %v1195_v41 = vpop.f32.mrb[17].mxu1 }
 0x9b3   : > { %v1210_v42 = vadd.f32 %v1195_v41, %v2264_v0  ;;  %v1528_v43 = vpop.f32.mrb[18].mxu1 }
 0x9b4   : > { %v1223_v44 = vadd.f32 %v1427_v39, %v1212_v40  ;;  %v1213_v45 = vadd.f32 %v1528_v43, %v2274_v5  ;;  %v1198_v46 = vpop.f32.mrb[19].mxu1 }
 0x9b5   : > { %v1221_v47 = vadd.f32 %v1427_v39, %v1210_v42  ;;  %v1211_v1 = vadd.f32 %v1198_v46, %v2268_v2 }
 0x9b6   : > { %1227 = vst.msk [vmem:[%s449_s19 + $0x10] sm:$0xff] %vm464_vm0, %v1223_v44  ;;  %v1224_v48 = vadd.f32 %v1427_v39, %v1213_v45 }
 0x9b7   : > { %1225 = vst.msk [vmem:[%s449_s19] sm:$0xff] %vm464_vm0, %v1221_v47  ;;  %v1222_v0 = vadd.f32 %v1427_v39, %v1211_v1 }
 0x9b8   : > { %1228 = vst.msk [vmem:[%s449_s19 + $0x18] sm:$0xff] %vm464_vm0, %v1224_v48 }
 0x9b9   : > { %1226 = vst.msk [vmem:[%s449_s19 + $0x8] sm:$0xff] %vm464_vm0, %v1222_v0 }
 0x9ba   : > { %1820 = shalt.err (!%p1817_p13)
}
 0x9bb   : > { %s1821_s9 = scalar_lea.hbm %s2406_s22, 512  ;;  %s1825_s14 = scalar_lea.hbm %s2523_s0, 2048 }
 0x9bc   : > { %p1822_p5 = scmp.ne.s32.totalorder %s2406_s22, %s1821_s9  ;;  %p1826_p3 = scmp.lt.u32.totalorder %s2406_s22, %s2523_s0 }
 0x9bd   : > { %p1827_p7 = scmp.lt.u32.totalorder %s1825_s14, %s1821_s9  ;;  %p1829_p1 = scmp.lt.u32.totalorder %s1821_s9, %s2406_s22 }
 0x9be   : > { %p1823_p10 = pnand %p1822_p5, %p2133_p11 }
 0x9bf   : > { %p1828_p12 = por %p1827_p7, %p1826_p3 }
 0x9c0   : > { %p1824_p0 = pneg %p1823_p10 }
 0x9c1   : > { %p1830_p2 = por %p1829_p1, %p1828_p12 }
 0x9c3   : > { %p1831_p9 = pnand %p1830_p2, %p1824_p0 }
 0x9c5   : > { %1834 = shalt.err (!%p1831_p9)
}
 0x9c6   : > { %s1934_s29 = smov 128   ;;  %s1935_s7 = smov 8  }
 0x9c7   : > { %1541 = dma.vmem_to_hbm [thread:$0]  (%p2133_p11), %s2399_s2, 512, %s2406_s22, %s1230_s23, %s1934_s29, %s1934_s29, %s1935_s7  }
 0x9c8 PF: > { %s2524_s17 = sld [smem:[#allocation17_spill]]  ;;  %s2525_s19 = sld [smem:[#allocation21_spill]] }
 0x9c9   : > { %p1566_p4 = scmp.ge.s32.totalorder %s1917_s16, 2 }
 0x9ce   : > { %s1261_s15 = sand.u32 1, %s2524_s17   ;;  %p2526_p6 = scmp.ne.s32.totalorder %s2525_s19, 0 }
 0x9cf   : > { %s1262_s13 = scalar_lea.sflag [#allocation5], %s1261_s15 }
 0x9d0   : > { %p1558_p8 = pnand %p1566_p4, %p2526_p6 }
 0x9d2   : > { %1884 = dma.done.wait (!%p1558_p8), %s1262_s13, 512  }
 0x9d3   : > { %1886 = vsyncadd (!%p1558_p8), %s1262_s13, 4294966784  ;;  %s29_s16 = sadd.s32 1, %s1917_s16   ;;  %s2527_s18 = sld [smem:[#allocation24_spill]] }
 0x9d4   : > { %p26_p13 = scmp.ge.s32.totalorder %s29_s16, 6   ;;  %s2528_s12 = sld [smem:[#allocation19_spill]] }
 0x9d5   : > { %s2529_s13 = sld [smem:[#allocation20_spill]]  ;;  %s2530_s14 = sld [smem:[#allocation22_spill]] }
 0x9d6   : > { %s2531_s15 = sld [smem:[#allocation23_spill]]  ;;  %s2532_s30 = smov %s1893_s10 }
 0x9d7   : > { %s2533_s10 = smov %s1897_s11  ;;  %28 = sbr.rel (!%p26_p13) target bundleno = 16 (0x10), region = 123 }
 0x9d9   : > { %s2534_s11 = smov %s2527_s18 }
 0x9de   :  { %1267 = vsyncpa [#allocation4], 1 }
 0x9df   :  { %1269 = vsyncpa [#allocation4 + $0x1], 1 }
 0x9e0   :  { %1270 = vsyncpa [#allocation7], 1 }
 0x9e1   :  { %1272 = vsyncpa [#allocation7 + $0x1], 1 }
 0x9e2   :  { %1273 = vsyncpa [#allocation10], 1 }
 0x9e3   :  { %1274 = vsyncpa [#allocation5], 1 }
 0x9e4   :  { %1276 = vsyncpa [#allocation5 + $0x1], 1 }

</bundles_post_ra>
